<compile_context>
chip_gen: v6e
topology: v6e:2x2x1
jax: 0.10.0
libtpu: 0.0.40
codegen_flags: <defaults>
</compile_context>

<pallas_src>
import math

import jax
import jax.numpy as jnp
from jax import lax
from jax.experimental import pallas as pl
from jax.experimental.pallas import tpu as pltpu

LANE = 128


def _pad_to_lane(d):
    return ((d + LANE - 1) // LANE) * LANE


# ----------------------------- Pallas kernel ------------------------------ #

def _make_layer_kernel(n_seg, block_b, rep_pad, compute_dtype):
    """Kernel for one GraphSageLayer over a (block_b, N, *) batch block."""
    cdt = compute_dtype

    def kernel(*refs):
        x_refs = refs[0:n_seg]                       # each (Bt, N, Dk_pad) cdt
        adj_ref = refs[n_seg]                        # (Bt, N, N) cdt
        inv_row_ref = refs[n_seg + 1]                # (Bt, N, 1) f32
        inv_col_ref = refs[n_seg + 2]                # (Bt, N, 1) f32
        w_refs = refs[n_seg + 3:2 * n_seg + 3]       # each (Dk_pad, 3*Rp) cdt
        b_proj_ref = refs[2 * n_seg + 3]             # (1, 3*Rp) f32
        w_u1_ref = refs[2 * n_seg + 4]               # (Rp, Dop) cdt
        w_u2_ref = refs[2 * n_seg + 5]
        w_u3_ref = refs[2 * n_seg + 6]
        b_upd_ref = refs[2 * n_seg + 7]              # (1, Dop) f32
        out_ref = refs[2 * n_seg + 8]                # (Bt, N, Dop) cdt

        for bb in range(block_b):
            # Fused projection: one MXU matmul per input segment, f32 accumulate.
            acc = None
            for k in range(n_seg):
                c = jnp.dot(x_refs[k][bb], w_refs[k][...],
                            preferred_element_type=jnp.float32)
                acc = c if acc is None else acc + c
            proj = acc + b_proj_ref[...]                        # (N, 3*Rp) f32

            # Lane slices at multiples of 128 (free).
            src_rep = proj[:, 0 * rep_pad:1 * rep_pad]
            dst_rep = proj[:, 1 * rep_pad:2 * rep_pad]
            self_rep = proj[:, 2 * rep_pad:3 * rep_pad]

            adj_b = adj_ref[bb]                                 # (N, N) cdt

            # Raw aggregations, then scale the (N, Rp) results (== normalizing adj).
            src_agg = jnp.dot(adj_b, src_rep.astype(cdt),
                              preferred_element_type=jnp.float32) * inv_row_ref[bb]
            dst_agg = lax.dot_general(adj_b, dst_rep.astype(cdt),
                                      dimension_numbers=(((0,), (0,)), ((), ())),
                                      preferred_element_type=jnp.float32
                                      ) * inv_col_ref[bb]

            # node_update(cat(src, self, dst)) as a split-matmul sum (no lane concat).
            out = (jnp.dot(src_agg.astype(cdt), w_u1_ref[...],
                           preferred_element_type=jnp.float32)
                   + jnp.dot(self_rep.astype(cdt), w_u2_ref[...],
                             preferred_element_type=jnp.float32)
                   + jnp.dot(dst_agg.astype(cdt), w_u3_ref[...],
                             preferred_element_type=jnp.float32)
                   + b_upd_ref[...])

            # fuzzy_relu (assumed leaky_relu, slope 0.1), in f32.
            out = jnp.where(out > 0.0, out, jnp.float32(0.1) * out)
            out_ref[bb] = out.astype(out_ref.dtype)

    return kernel


def _pick_block_b(B, N, seg_pads, out_pad, itemsize):
    """Largest batch block (capped, divides B) whose double-buffered blocks stay small."""
    per_b = (N * N + N * sum(seg_pads) + N * out_pad) * itemsize + 2 * N * 4
    budget = 8 * 1024 * 1024
    bt = min(B, 8, max(1, budget // max(1, 2 * per_b)))
    while B % bt != 0:
        bt -= 1
    return bt


def graphsage_layer_pallas(x_segs, adj, inv_row, inv_col, p, compute_dtype):
    """x_segs: list of (B, N, Dk_pad) compute_dtype arrays; adj: (B, N, N) compute_dtype;
    inv_row/inv_col: (B, N, 1) f32; p: padded/fused layer params (already cast)."""
    B, N, _ = adj.shape
    Rp = p["rep_pad"]
    Dop = p["out_pad"]
    n_seg = len(x_segs)
    seg_pads = [int(x.shape[-1]) for x in x_segs]
    itemsize = jnp.dtype(compute_dtype).itemsize
    Bt = _pick_block_b(B, N, seg_pads, Dop, itemsize)

    kernel = _make_layer_kernel(n_seg, Bt, Rp, compute_dtype)

    def blk3(arr):
        return pl.BlockSpec((Bt,) + tuple(arr.shape[1:]), lambda b: (b, 0, 0))

    def whole(arr):
        nd = arr.ndim
        return pl.BlockSpec(tuple(arr.shape), lambda b: (0,) * nd)

    in_specs = ([blk3(x) for x in x_segs]
                + [blk3(adj), blk3(inv_row), blk3(inv_col)]
                + [whole(w) for w in p["w_proj_segs"]]
                + [whole(p["b_proj"]), whole(p["w_u1"]), whole(p["w_u2"]),
                   whole(p["w_u3"]), whole(p["b_upd"])])

    return pl.pallas_call(
        kernel,
        out_shape=jax.ShapeDtypeStruct((B, N, Dop), compute_dtype),
        grid=(B // Bt,),
        in_specs=in_specs,
        out_specs=pl.BlockSpec((Bt, N, Dop), lambda b: (b, 0, 0)),
        compiler_params=pltpu.CompilerParams(dimension_semantics=("parallel",)),
    )(*x_segs, adj, inv_row, inv_col, *p["w_proj_segs"],
      p["b_proj"], p["w_u1"], p["w_u2"], p["w_u3"], p["b_upd"])


# ------------------------- parameter construction ------------------------- #

def _init_linear(key, fan_in, fan_out):
    # PyTorch nn.Linear default init: U(-1/sqrt(fan_in), 1/sqrt(fan_in)).
    kw, kb = jax.random.split(key)
    bound = 1.0 / math.sqrt(fan_in)
    w = jax.random.uniform(kw, (fan_in, fan_out), jnp.float32, -bound, bound)
    b = jax.random.uniform(kb, (fan_out,), jnp.float32, -bound, bound)
    return w, b


def init_graphsage_layer_params(key, seg_dims, output_dim, rep_size):
    input_dim = sum(seg_dims)
    ks = jax.random.split(key, 4)
    w_src, b_src = _init_linear(ks[0], input_dim, rep_size)
    w_dst, b_dst = _init_linear(ks[1], input_dim, rep_size)
    w_self, b_self = _init_linear(ks[2], input_dim, rep_size)
    w_upd, b_upd = _init_linear(ks[3], 3 * rep_size, output_dim)

    Rp = _pad_to_lane(rep_size)
    Dop = _pad_to_lane(output_dim)

    # Per-segment fused projection weight: (Dk_pad, 3*Rp), padding rows/cols zero.
    w_proj_segs = []
    off = 0
    for d in seg_dims:
        dk_pad = _pad_to_lane(d)
        w = jnp.zeros((dk_pad, 3 * Rp), jnp.float32)
        w = w.at[:d, 0:rep_size].set(w_src[off:off + d])
        w = w.at[:d, Rp:Rp + rep_size].set(w_dst[off:off + d])
        w = w.at[:d, 2 * Rp:2 * Rp + rep_size].set(w_self[off:off + d])
        w_proj_segs.append(w)
        off += d

    b_proj = jnp.zeros((1, 3 * Rp), jnp.float32)
    b_proj = b_proj.at[0, 0:rep_size].set(b_src)
    b_proj = b_proj.at[0, Rp:Rp + rep_size].set(b_dst)
    b_proj = b_proj.at[0, 2 * Rp:2 * Rp + rep_size].set(b_self)

    def pad_u(w_part):
        z = jnp.zeros((Rp, Dop), jnp.float32)
        return z.at[:rep_size, :output_dim].set(w_part)

    b_upd_p = jnp.zeros((1, Dop), jnp.float32).at[0, :output_dim].set(b_upd)

    return {
        # logical (for the f32 faithful reference)
        "w_src": w_src, "b_src": b_src,
        "w_dst": w_dst, "b_dst": b_dst,
        "w_self": w_self, "b_self": b_self,
        "w_upd": w_upd, "b_upd_vec": b_upd,
        # padded / fused (consumed by the Pallas kernel)
        "seg_dims": seg_dims, "rep_size": rep_size, "rep_pad": Rp,
        "out_dim": output_dim, "out_pad": Dop,
        "w_proj_segs": w_proj_segs, "b_proj": b_proj,
        "w_u1": pad_u(w_upd[0:rep_size]),
        "w_u2": pad_u(w_upd[rep_size:2 * rep_size]),
        "w_u3": pad_u(w_upd[2 * rep_size:3 * rep_size]),
        "b_upd": b_upd_p,
    }


def init_pyramid_params(key, num_layers, feature_sizes, representation_sizes=None):
    assert num_layers % 2 == 0
    assert num_layers == len(feature_sizes) - 1
    if representation_sizes is None:
        representation_sizes = feature_sizes[:-1]
    half = num_layers // 2
    keys = jax.random.split(key, num_layers)
    params = []
    for i in range(num_layers):
        if i < half:
            seg_dims = [feature_sizes[i]]
        elif i == half:
            seg_dims = [feature_sizes[i], feature_sizes[num_layers - i - 1]]
        else:
            seg_dims = [feature_sizes[i], feature_sizes[num_layers - i],
                        feature_sizes[num_layers - i - 1]]
        params.append(init_graphsage_layer_params(
            keys[i], seg_dims, feature_sizes[i + 1], representation_sizes[i]))
    return params


def _cast_layer_params(p, cdt):
    q = dict(p)
    q["w_proj_segs"] = [w.astype(cdt) for w in p["w_proj_segs"]]
    q["w_u1"] = p["w_u1"].astype(cdt)
    q["w_u2"] = p["w_u2"].astype(cdt)
    q["w_u3"] = p["w_u3"].astype(cdt)
    return q


# ------------------------------ forward pass ------------------------------ #

def pyramid_forward(params, nodes_padded, adj, num_layers, layer_fn,
                    compute_dtype=jnp.bfloat16):
    """Padded-feature forward.  Adjacency norms are computed ONCE (hoisted)."""
    adj32 = adj.astype(jnp.float32)
    eps = jnp.float32(1e-12)
    row_norm = jnp.sqrt(jnp.sum(adj32 * adj32, axis=2))          # ||adj[b,i,:]||
    col_norm = jnp.sqrt(jnp.sum(adj32 * adj32, axis=1))          # ||adj[b,:,j]||
    inv_row = (1.0 / jnp.maximum(row_norm, eps))[..., None]      # (B, N, 1)
    inv_col = (1.0 / jnp.maximum(col_norm, eps))[..., None]      # (B, N, 1)
    adj_c = adj32.astype(compute_dtype)

    fpass = nodes_padded.astype(compute_dtype)
    stash = []
    half = num_layers // 2
    for i in range(num_layers):
        if i < half:
            stash.append(fpass)
            segs = [fpass]
        elif i == half:
            segs = [fpass, stash[num_layers - i - 1]]
        else:
            segs = [fpass, stash[num_layers - i], stash[num_layers - i - 1]]
        p = _cast_layer_params(params[i], compute_dtype)
        fpass = layer_fn(segs, adj_c, inv_row, inv_col, p, compute_dtype)
    return fpass  # (B, N, pad(feature_sizes[-1])), compute_dtype


# Pure-JAX mirror of the kernel pipeline (same padding / dtype recipe).
def graphsage_layer_mirror(x_segs, adj_c, inv_row, inv_col, p, compute_dtype):
    cdt = compute_dtype
    Rp = p["rep_pad"]
    acc = None
    for x, w in zip(x_segs, p["w_proj_segs"]):
        c = jnp.einsum("bnd,dr->bnr", x, w.astype(cdt),
                       preferred_element_type=jnp.float32)
        acc = c if acc is None else acc + c
    proj = acc + p["b_proj"]
    src = proj[..., 0 * Rp:1 * Rp]
    dst = proj[..., 1 * Rp:2 * Rp]
    slf = proj[..., 2 * Rp:3 * Rp]
    s_agg = jnp.einsum("bij,bjr->bir", adj_c, src.astype(cdt),
                       preferred_element_type=jnp.float32) * inv_row
    d_agg = jnp.einsum("bji,bjr->bir", adj_c, dst.astype(cdt),
                       preferred_element_type=jnp.float32) * inv_col
    out = (jnp.einsum("bnr,rd->bnd", s_agg.astype(cdt), p["w_u1"].astype(cdt),
                      preferred_element_type=jnp.float32)
           + jnp.einsum("bnr,rd->bnd", slf.astype(cdt), p["w_u2"].astype(cdt),
                        preferred_element_type=jnp.float32)
           + jnp.einsum("bnr,rd->bnd", d_agg.astype(cdt), p["w_u3"].astype(cdt),
                        preferred_element_type=jnp.float32)
           + p["b_upd"])
    out = jnp.where(out > 0.0, out, 0.1 * out)
    return out.astype(cdt)


# Pure-f32, unpadded reference reproducing the PyTorch module exactly.
def graphsage_layer_faithful(x, adj, p):
    eps = 1e-12
    src = x @ p["w_src"] + p["b_src"]
    conn = adj / jnp.maximum(jnp.linalg.norm(adj, axis=2, keepdims=True), eps)
    src = jnp.einsum("bjv,bij->biv", src, conn)
    dst = x @ p["w_dst"] + p["b_dst"]
    conn = adj / jnp.maximum(jnp.linalg.norm(adj, axis=1, keepdims=True), eps)
    dst = jnp.einsum("bjv,bji->biv", dst, conn)
    slf = x @ p["w_self"] + p["b_self"]
    upd = jnp.concatenate([src, slf, dst], axis=2)
    out = upd @ p["w_upd"] + p["b_upd_vec"]
    return jnp.where(out > 0, out, 0.1 * out)


def pyramid_forward_faithful(params, nodes, adj, num_layers):
    fpass = nodes
    stash = []
    half = num_layers // 2
    for i in range(num_layers):
        if i < half:
            stash.append(fpass)
        elif i == half:
            fpass = jnp.concatenate((fpass, stash[num_layers - i - 1]), axis=2)
        else:
            fpass = jnp.concatenate(
                (fpass, stash[num_layers - i], stash[num_layers - i - 1]), axis=2)
        fpass = graphsage_layer_faithful(fpass, adj, params[i])
    return fpass


# ---------------------------------- main ----------------------------------- #

if __name__ == "__main__":
    num_layers = 4
    feature_sizes = [8, 16, 16, 16, 8]
    B, N = 2, 16

    key = jax.random.PRNGKey(0)
    k_params, k_x, k_adj = jax.random.split(key, 3)

    params = init_pyramid_params(k_params, num_layers, feature_sizes)
    nodes = jax.random.normal(k_x, (B, N, feature_sizes[0]), jnp.float32)
    adj = jax.random.uniform(k_adj, (B, N, N), jnp.float32)

    d0 = feature_sizes[0]
    nodes_padded = jnp.pad(nodes, ((0, 0), (0, 0), (0, _pad_to_lane(d0) - d0)))
    out_dim = feature_sizes[-1]

    # 1) f32 kernel pipeline vs faithful (PyTorch-semantics) reference — tight check.
    out_f32 = pyramid_forward(params, nodes_padded, adj, num_layers,
                              graphsage_layer_pallas, compute_dtype=jnp.float32)
    out_f32 = jax.block_until_ready(out_f32)[..., :out_dim].astype(jnp.float32)
    ref_f32 = pyramid_forward_faithful(params, nodes, adj, num_layers)
    assert out_f32.shape == (B, N, out_dim)
    assert jnp.allclose(out_f32, ref_f32, rtol=1e-3, atol=1e-3), "f32 mismatch"

    # 2) bf16 (performance) kernel pipeline vs its pure-JAX mirror.
    out_bf = pyramid_forward(params, nodes_padded, adj, num_layers,
                             graphsage_layer_pallas, compute_dtype=jnp.bfloat16)
    out_bf = jax.block_until_ready(out_bf)[..., :out_dim].astype(jnp.float32)
    ref_bf = pyramid_forward(params, nodes_padded, adj, num_layers,
                             graphsage_layer_mirror, compute_dtype=jnp.bfloat16)
    ref_bf = ref_bf[..., :out_dim].astype(jnp.float32)
    assert jnp.allclose(out_bf, ref_bf, rtol=2e-2, atol=2e-2), "bf16 mismatch"

    print("KERNEL_OK")
</pallas_src>

<mosaic_0001>
module attributes {stable_mosaic.version = 11 : i64} {
  func.func @kernel(%arg0: i32, %arg1: memref<2x16x128xf32, #tpu.memory_space<vmem>>, %arg2: memref<2x16x16xf32, #tpu.memory_space<vmem>>, %arg3: memref<2x16x1xf32, #tpu.memory_space<vmem>>, %arg4: memref<2x16x1xf32, #tpu.memory_space<vmem>>, %arg5: memref<128x384xf32, #tpu.memory_space<vmem>>, %arg6: memref<1x384xf32, #tpu.memory_space<vmem>>, %arg7: memref<128x128xf32, #tpu.memory_space<vmem>>, %arg8: memref<128x128xf32, #tpu.memory_space<vmem>>, %arg9: memref<128x128xf32, #tpu.memory_space<vmem>>, %arg10: memref<1x128xf32, #tpu.memory_space<vmem>>, %arg11: memref<2x16x128xf32, #tpu.memory_space<vmem>>) attributes {dimension_semantics = [#tpu.dimension_semantics<parallel>], iteration_bounds = array<i64: 1>, scalar_prefetch = 0 : i64, scratch_operands = 0 : i64, tpu.core_type = #tpu.core_type<tc>, window_params = [{transform_indices = @transform_0, window_bounds = array<i64: 2, 16, 128>}, {transform_indices = @transform_1, window_bounds = array<i64: 2, 16, 16>}, {transform_indices = @transform_2, window_bounds = array<i64: 2, 16, 1>}, {transform_indices = @transform_3, window_bounds = array<i64: 2, 16, 1>}, {pipeline_mode = #tpu.pipeline_mode<synchronous>, transform_indices = @transform_4, window_bounds = array<i64: 128, 384>}, {pipeline_mode = #tpu.pipeline_mode<synchronous>, transform_indices = @transform_5, window_bounds = array<i64: 1, 384>}, {pipeline_mode = #tpu.pipeline_mode<synchronous>, transform_indices = @transform_6, window_bounds = array<i64: 128, 128>}, {pipeline_mode = #tpu.pipeline_mode<synchronous>, transform_indices = @transform_7, window_bounds = array<i64: 128, 128>}, {pipeline_mode = #tpu.pipeline_mode<synchronous>, transform_indices = @transform_8, window_bounds = array<i64: 128, 128>}, {pipeline_mode = #tpu.pipeline_mode<synchronous>, transform_indices = @transform_9, window_bounds = array<i64: 1, 128>}, {transform_indices = @transform_10, window_bounds = array<i64: 2, 16, 128>}]} {
    %c0 = arith.constant 0 : index
    %c0_0 = arith.constant 0 : index
    %c0_1 = arith.constant 0 : index
    %0 = vector.load %arg1[%c0, %c0_0, %c0_1] : memref<2x16x128xf32, #tpu.memory_space<vmem>>, vector<1x16x128xf32>
    %1 = vector.shape_cast %0 : vector<1x16x128xf32> to vector<16x128xf32>
    %c0_2 = arith.constant 0 : index
    %c0_3 = arith.constant 0 : index
    %2 = vector.load %arg5[%c0_2, %c0_3] : memref<128x384xf32, #tpu.memory_space<vmem>>, vector<128x384xf32>
    %cst = arith.constant dense<0.000000e+00> : vector<16x384xf32>
    %3 = tpu.matmul %1, %2, %cst {dimension_numbers = #tpu.dot_dimension_numbers<[1], [0], [0], [1], [0, 0, 1, 1], [], []>} : vector<16x128xf32>, vector<128x384xf32>, vector<16x384xf32> -> vector<16x384xf32>
    %c0_4 = arith.constant 0 : index
    %c0_5 = arith.constant 0 : index
    %4 = vector.load %arg6[%c0_4, %c0_5] : memref<1x384xf32, #tpu.memory_space<vmem>>, vector<1x384xf32>
    %5 = vector.broadcast %4 : vector<1x384xf32> to vector<16x384xf32>
    %6 = arith.addf %3, %5 : vector<16x384xf32>
    %7 = vector.extract_strided_slice %6 {offsets = [0, 0], sizes = [16, 128], strides = [1, 1]} : vector<16x384xf32> to vector<16x128xf32>
    %8 = vector.extract_strided_slice %6 {offsets = [0, 128], sizes = [16, 128], strides = [1, 1]} : vector<16x384xf32> to vector<16x128xf32>
    %9 = vector.extract_strided_slice %6 {offsets = [0, 256], sizes = [16, 128], strides = [1, 1]} : vector<16x384xf32> to vector<16x128xf32>
    %c0_6 = arith.constant 0 : index
    %c0_7 = arith.constant 0 : index
    %c0_8 = arith.constant 0 : index
    %10 = vector.load %arg2[%c0_6, %c0_7, %c0_8] : memref<2x16x16xf32, #tpu.memory_space<vmem>>, vector<1x16x16xf32>
    %11 = vector.shape_cast %10 : vector<1x16x16xf32> to vector<16x16xf32>
    %cst_9 = arith.constant dense<0.000000e+00> : vector<16x128xf32>
    %12 = tpu.matmul %11, %7, %cst_9 {dimension_numbers = #tpu.dot_dimension_numbers<[1], [0], [0], [1], [0, 0, 1, 1], [], []>} : vector<16x16xf32>, vector<16x128xf32>, vector<16x128xf32> -> vector<16x128xf32>
    %c0_10 = arith.constant 0 : index
    %c0_11 = arith.constant 0 : index
    %c0_12 = arith.constant 0 : index
    %13 = vector.load %arg3[%c0_10, %c0_11, %c0_12] : memref<2x16x1xf32, #tpu.memory_space<vmem>>, vector<1x16x1xf32>
    %14 = vector.shape_cast %13 : vector<1x16x1xf32> to vector<16x1xf32>
    %15 = vector.broadcast %14 : vector<16x1xf32> to vector<16x128xf32>
    %16 = arith.mulf %12, %15 : vector<16x128xf32>
    %cst_13 = arith.constant dense<0.000000e+00> : vector<16x128xf32>
    %17 = tpu.matmul %11, %8, %cst_13 {dimension_numbers = #tpu.dot_dimension_numbers<[0], [0], [1], [1], [0, 1, 1, 1], [], []>} : vector<16x16xf32>, vector<16x128xf32>, vector<16x128xf32> -> vector<16x128xf32>
    %c0_14 = arith.constant 0 : index
    %c0_15 = arith.constant 0 : index
    %c0_16 = arith.constant 0 : index
    %18 = vector.load %arg4[%c0_14, %c0_15, %c0_16] : memref<2x16x1xf32, #tpu.memory_space<vmem>>, vector<1x16x1xf32>
    %19 = vector.shape_cast %18 : vector<1x16x1xf32> to vector<16x1xf32>
    %20 = vector.broadcast %19 : vector<16x1xf32> to vector<16x128xf32>
    %21 = arith.mulf %17, %20 : vector<16x128xf32>
    %c0_17 = arith.constant 0 : index
    %c0_18 = arith.constant 0 : index
    %22 = vector.load %arg7[%c0_17, %c0_18] : memref<128x128xf32, #tpu.memory_space<vmem>>, vector<128x128xf32>
    %cst_19 = arith.constant dense<0.000000e+00> : vector<16x128xf32>
    %23 = tpu.matmul %16, %22, %cst_19 {dimension_numbers = #tpu.dot_dimension_numbers<[1], [0], [0], [1], [0, 0, 1, 1], [], []>} : vector<16x128xf32>, vector<128x128xf32>, vector<16x128xf32> -> vector<16x128xf32>
    %c0_20 = arith.constant 0 : index
    %c0_21 = arith.constant 0 : index
    %24 = vector.load %arg8[%c0_20, %c0_21] : memref<128x128xf32, #tpu.memory_space<vmem>>, vector<128x128xf32>
    %cst_22 = arith.constant dense<0.000000e+00> : vector<16x128xf32>
    %25 = tpu.matmul %9, %24, %cst_22 {dimension_numbers = #tpu.dot_dimension_numbers<[1], [0], [0], [1], [0, 0, 1, 1], [], []>} : vector<16x128xf32>, vector<128x128xf32>, vector<16x128xf32> -> vector<16x128xf32>
    %26 = arith.addf %23, %25 : vector<16x128xf32>
    %c0_23 = arith.constant 0 : index
    %c0_24 = arith.constant 0 : index
    %27 = vector.load %arg9[%c0_23, %c0_24] : memref<128x128xf32, #tpu.memory_space<vmem>>, vector<128x128xf32>
    %cst_25 = arith.constant dense<0.000000e+00> : vector<16x128xf32>
    %28 = tpu.matmul %21, %27, %cst_25 {dimension_numbers = #tpu.dot_dimension_numbers<[1], [0], [0], [1], [0, 0, 1, 1], [], []>} : vector<16x128xf32>, vector<128x128xf32>, vector<16x128xf32> -> vector<16x128xf32>
    %29 = arith.addf %26, %28 : vector<16x128xf32>
    %c0_26 = arith.constant 0 : index
    %c0_27 = arith.constant 0 : index
    %30 = vector.load %arg10[%c0_26, %c0_27] : memref<1x128xf32, #tpu.memory_space<vmem>>, vector<1x128xf32>
    %31 = vector.broadcast %30 : vector<1x128xf32> to vector<16x128xf32>
    %32 = arith.addf %29, %31 : vector<16x128xf32>
    %cst_28 = arith.constant 0.000000e+00 : f32
    %33 = vector.broadcast %cst_28 : f32 to vector<16x128xf32>
    %34 = arith.cmpf ogt, %32, %33 : vector<16x128xf32>
    %cst_29 = arith.constant 1.000000e-01 : f32
    %35 = vector.broadcast %cst_29 : f32 to vector<16x128xf32>
    %36 = arith.mulf %35, %32 : vector<16x128xf32>
    %37 = arith.select %34, %32, %36 : vector<16x128xi1>, vector<16x128xf32>
    %c0_30 = arith.constant 0 : index
    %c0_31 = arith.constant 0 : index
    %c0_32 = arith.constant 0 : index
    %38 = vector.load %arg11[%c0_30, %c0_31, %c0_32] : memref<2x16x128xf32, #tpu.memory_space<vmem>>, vector<1x16x128xf32>
    %39 = vector.shape_cast %38 : vector<1x16x128xf32> to vector<16x128xf32>
    %40 = vector.shape_cast %37 : vector<16x128xf32> to vector<1x16x128xf32>
    tpu.vector_store %arg11[%c0_30, %c0_31, %c0_32], %40 {strides = array<i32>} : memref<2x16x128xf32, #tpu.memory_space<vmem>>, vector<1x16x128xf32>,
    %c1 = arith.constant 1 : index
    %c0_33 = arith.constant 0 : index
    %c0_34 = arith.constant 0 : index
    %41 = vector.load %arg1[%c1, %c0_33, %c0_34] : memref<2x16x128xf32, #tpu.memory_space<vmem>>, vector<1x16x128xf32>
    %42 = vector.shape_cast %41 : vector<1x16x128xf32> to vector<16x128xf32>
    %c0_35 = arith.constant 0 : index
    %c0_36 = arith.constant 0 : index
    %43 = vector.load %arg5[%c0_35, %c0_36] : memref<128x384xf32, #tpu.memory_space<vmem>>, vector<128x384xf32>
    %cst_37 = arith.constant dense<0.000000e+00> : vector<16x384xf32>
    %44 = tpu.matmul %42, %43, %cst_37 {dimension_numbers = #tpu.dot_dimension_numbers<[1], [0], [0], [1], [0, 0, 1, 1], [], []>} : vector<16x128xf32>, vector<128x384xf32>, vector<16x384xf32> -> vector<16x384xf32>
    %c0_38 = arith.constant 0 : index
    %c0_39 = arith.constant 0 : index
    %45 = vector.load %arg6[%c0_38, %c0_39] : memref<1x384xf32, #tpu.memory_space<vmem>>, vector<1x384xf32>
    %46 = vector.broadcast %45 : vector<1x384xf32> to vector<16x384xf32>
    %47 = arith.addf %44, %46 : vector<16x384xf32>
    %48 = vector.extract_strided_slice %47 {offsets = [0, 0], sizes = [16, 128], strides = [1, 1]} : vector<16x384xf32> to vector<16x128xf32>
    %49 = vector.extract_strided_slice %47 {offsets = [0, 128], sizes = [16, 128], strides = [1, 1]} : vector<16x384xf32> to vector<16x128xf32>
    %50 = vector.extract_strided_slice %47 {offsets = [0, 256], sizes = [16, 128], strides = [1, 1]} : vector<16x384xf32> to vector<16x128xf32>
    %c1_40 = arith.constant 1 : index
    %c0_41 = arith.constant 0 : index
    %c0_42 = arith.constant 0 : index
    %51 = vector.load %arg2[%c1_40, %c0_41, %c0_42] : memref<2x16x16xf32, #tpu.memory_space<vmem>>, vector<1x16x16xf32>
    %52 = vector.shape_cast %51 : vector<1x16x16xf32> to vector<16x16xf32>
    %cst_43 = arith.constant dense<0.000000e+00> : vector<16x128xf32>
    %53 = tpu.matmul %52, %48, %cst_43 {dimension_numbers = #tpu.dot_dimension_numbers<[1], [0], [0], [1], [0, 0, 1, 1], [], []>} : vector<16x16xf32>, vector<16x128xf32>, vector<16x128xf32> -> vector<16x128xf32>
    %c1_44 = arith.constant 1 : index
    %c0_45 = arith.constant 0 : index
    %c0_46 = arith.constant 0 : index
    %54 = vector.load %arg3[%c1_44, %c0_45, %c0_46] : memref<2x16x1xf32, #tpu.memory_space<vmem>>, vector<1x16x1xf32>
    %55 = vector.shape_cast %54 : vector<1x16x1xf32> to vector<16x1xf32>
    %56 = vector.broadcast %55 : vector<16x1xf32> to vector<16x128xf32>
    %57 = arith.mulf %53, %56 : vector<16x128xf32>
    %cst_47 = arith.constant dense<0.000000e+00> : vector<16x128xf32>
    %58 = tpu.matmul %52, %49, %cst_47 {dimension_numbers = #tpu.dot_dimension_numbers<[0], [0], [1], [1], [0, 1, 1, 1], [], []>} : vector<16x16xf32>, vector<16x128xf32>, vector<16x128xf32> -> vector<16x128xf32>
    %c1_48 = arith.constant 1 : index
    %c0_49 = arith.constant 0 : index
    %c0_50 = arith.constant 0 : index
    %59 = vector.load %arg4[%c1_48, %c0_49, %c0_50] : memref<2x16x1xf32, #tpu.memory_space<vmem>>, vector<1x16x1xf32>
    %60 = vector.shape_cast %59 : vector<1x16x1xf32> to vector<16x1xf32>
    %61 = vector.broadcast %60 : vector<16x1xf32> to vector<16x128xf32>
    %62 = arith.mulf %58, %61 : vector<16x128xf32>
    %c0_51 = arith.constant 0 : index
    %c0_52 = arith.constant 0 : index
    %63 = vector.load %arg7[%c0_51, %c0_52] : memref<128x128xf32, #tpu.memory_space<vmem>>, vector<128x128xf32>
    %cst_53 = arith.constant dense<0.000000e+00> : vector<16x128xf32>
    %64 = tpu.matmul %57, %63, %cst_53 {dimension_numbers = #tpu.dot_dimension_numbers<[1], [0], [0], [1], [0, 0, 1, 1], [], []>} : vector<16x128xf32>, vector<128x128xf32>, vector<16x128xf32> -> vector<16x128xf32>
    %c0_54 = arith.constant 0 : index
    %c0_55 = arith.constant 0 : index
    %65 = vector.load %arg8[%c0_54, %c0_55] : memref<128x128xf32, #tpu.memory_space<vmem>>, vector<128x128xf32>
    %cst_56 = arith.constant dense<0.000000e+00> : vector<16x128xf32>
    %66 = tpu.matmul %50, %65, %cst_56 {dimension_numbers = #tpu.dot_dimension_numbers<[1], [0], [0], [1], [0, 0, 1, 1], [], []>} : vector<16x128xf32>, vector<128x128xf32>, vector<16x128xf32> -> vector<16x128xf32>
    %67 = arith.addf %64, %66 : vector<16x128xf32>
    %c0_57 = arith.constant 0 : index
    %c0_58 = arith.constant 0 : index
    %68 = vector.load %arg9[%c0_57, %c0_58] : memref<128x128xf32, #tpu.memory_space<vmem>>, vector<128x128xf32>
    %cst_59 = arith.constant dense<0.000000e+00> : vector<16x128xf32>
    %69 = tpu.matmul %62, %68, %cst_59 {dimension_numbers = #tpu.dot_dimension_numbers<[1], [0], [0], [1], [0, 0, 1, 1], [], []>} : vector<16x128xf32>, vector<128x128xf32>, vector<16x128xf32> -> vector<16x128xf32>
    %70 = arith.addf %67, %69 : vector<16x128xf32>
    %c0_60 = arith.constant 0 : index
    %c0_61 = arith.constant 0 : index
    %71 = vector.load %arg10[%c0_60, %c0_61] : memref<1x128xf32, #tpu.memory_space<vmem>>, vector<1x128xf32>
    %72 = vector.broadcast %71 : vector<1x128xf32> to vector<16x128xf32>
    %73 = arith.addf %70, %72 : vector<16x128xf32>
    %cst_62 = arith.constant 0.000000e+00 : f32
    %74 = vector.broadcast %cst_62 : f32 to vector<16x128xf32>
    %75 = arith.cmpf ogt, %73, %74 : vector<16x128xf32>
    %cst_63 = arith.constant 1.000000e-01 : f32
    %76 = vector.broadcast %cst_63 : f32 to vector<16x128xf32>
    %77 = arith.mulf %76, %73 : vector<16x128xf32>
    %78 = arith.select %75, %73, %77 : vector<16x128xi1>, vector<16x128xf32>
    %c1_64 = arith.constant 1 : index
    %c0_65 = arith.constant 0 : index
    %c0_66 = arith.constant 0 : index
    %79 = vector.load %arg11[%c1_64, %c0_65, %c0_66] : memref<2x16x128xf32, #tpu.memory_space<vmem>>, vector<1x16x128xf32>
    %80 = vector.shape_cast %79 : vector<1x16x128xf32> to vector<16x128xf32>
    %81 = vector.shape_cast %78 : vector<16x128xf32> to vector<1x16x128xf32>
    tpu.vector_store %arg11[%c1_64, %c0_65, %c0_66], %81 {strides = array<i32>} : memref<2x16x128xf32, #tpu.memory_space<vmem>>, vector<1x16x128xf32>,
    return
  }
  func.func @transform_0(%arg0: i32) -> (i32, i32, i32) {
    %c0_i32 = arith.constant 0 : i32
    %c0_i32_0 = arith.constant 0 : i32
    %c0_i32_1 = arith.constant 0 : i32
    return %arg0, %c0_i32, %c0_i32_0 : i32, i32, i32
  }
  func.func @transform_1(%arg0: i32) -> (i32, i32, i32) {
    %c0_i32 = arith.constant 0 : i32
    %c0_i32_0 = arith.constant 0 : i32
    %c0_i32_1 = arith.constant 0 : i32
    return %arg0, %c0_i32, %c0_i32_0 : i32, i32, i32
  }
  func.func @transform_2(%arg0: i32) -> (i32, i32, i32) {
    %c0_i32 = arith.constant 0 : i32
    %c0_i32_0 = arith.constant 0 : i32
    %c0_i32_1 = arith.constant 0 : i32
    return %arg0, %c0_i32, %c0_i32_0 : i32, i32, i32
  }
  func.func @transform_3(%arg0: i32) -> (i32, i32, i32) {
    %c0_i32 = arith.constant 0 : i32
    %c0_i32_0 = arith.constant 0 : i32
    %c0_i32_1 = arith.constant 0 : i32
    return %arg0, %c0_i32, %c0_i32_0 : i32, i32, i32
  }
  func.func @transform_4(%arg0: i32) -> (i32, i32) {
    %c0_i32 = arith.constant 0 : i32
    %c0_i32_0 = arith.constant 0 : i32
    %c0_i32_1 = arith.constant 0 : i32
    return %c0_i32, %c0_i32_0 : i32, i32
  }
  func.func @transform_5(%arg0: i32) -> (i32, i32) {
    %c0_i32 = arith.constant 0 : i32
    %c0_i32_0 = arith.constant 0 : i32
    %c0_i32_1 = arith.constant 0 : i32
    return %c0_i32, %c0_i32_0 : i32, i32
  }
  func.func @transform_6(%arg0: i32) -> (i32, i32) {
    %c0_i32 = arith.constant 0 : i32
    %c0_i32_0 = arith.constant 0 : i32
    %c0_i32_1 = arith.constant 0 : i32
    return %c0_i32, %c0_i32_0 : i32, i32
  }
  func.func @transform_7(%arg0: i32) -> (i32, i32) {
    %c0_i32 = arith.constant 0 : i32
    %c0_i32_0 = arith.constant 0 : i32
    %c0_i32_1 = arith.constant 0 : i32
    return %c0_i32, %c0_i32_0 : i32, i32
  }
  func.func @transform_8(%arg0: i32) -> (i32, i32) {
    %c0_i32 = arith.constant 0 : i32
    %c0_i32_0 = arith.constant 0 : i32
    %c0_i32_1 = arith.constant 0 : i32
    return %c0_i32, %c0_i32_0 : i32, i32
  }
  func.func @transform_9(%arg0: i32) -> (i32, i32) {
    %c0_i32 = arith.constant 0 : i32
    %c0_i32_0 = arith.constant 0 : i32
    %c0_i32_1 = arith.constant 0 : i32
    return %c0_i32, %c0_i32_0 : i32, i32
  }
  func.func @transform_10(%arg0: i32) -> (i32, i32, i32) {
    %c0_i32 = arith.constant 0 : i32
    %c0_i32_0 = arith.constant 0 : i32
    %c0_i32_1 = arith.constant 0 : i32
    return %arg0, %c0_i32, %c0_i32_0 : i32, i32, i32
  }
}

</mosaic_0001>

<bundles_post_ra>
// kernel: tpu_custom_call.1
= control target key start
LH: loop header
LB: loop body
LE: loop exit
PB: predicated region body
PF: predicated region fallthrough
CT: control target
= control target key end

     0   :  { %15 = vsyncpa [#allocation3], 0  ;;  %s2912_s0 = inlined_call_operand.vmem [shape: f32[2,16,128], index: 0, kind: input, shape index: {}]   ;;  %s2913_s1 = inlined_call_operand.vmem [shape: f32[2,16,16], index: 1, kind: input, shape index: {}]   ;;  %s2914_s2 = inlined_call_operand.vmem [shape: f32[2,16,1], index: 2, kind: input, shape index: {}]   ;;  %s2915_s3 = inlined_call_operand.vmem [shape: f32[2,16,1], index: 3, kind: input, shape index: {}]   ;;  %s2916_s4 = inlined_call_operand.hbm [shape: f32[128,384], index: 4, kind: input, shape index: {}]   ;;  %s2917_s5 = inlined_call_operand.vmem [shape: f32[1,384], index: 5, kind: input, shape index: {}]   ;;  %s2918_s6 = inlined_call_operand.hbm [shape: f32[128,128], index: 6, kind: input, shape index: {}]   ;;  %s2919_s7 = inlined_call_operand.hbm [shape: f32[128,128], index: 7, kind: input, shape index: {}]   ;;  %s2920_s8 = inlined_call_operand.hbm [shape: f32[128,128], index: 8, kind: input, shape index: {}]   ;;  %s2921_s9 = inlined_call_operand.vmem [shape: f32[1,128], index: 9, kind: input, shape index: {}]   ;;  %s2922_s10 = inlined_call_operand.hbm [shape: f32[2,16,128], index: 10, kind: output, shape index: {}]  }
   0x1   :  { %16 = vsyncpa [#allocation6], 0 }
   0x2   :  { %17 = vsyncpa [#allocation9], 0 }
   0x3   :  { %18 = vsyncpa [#allocation4], 0  ;;  %s2193_s13 = smov [#allocation5]  }
   0x4   :  { %s46_s14 = sshll.u32 %s2193_s13, 4  ;;  %s47_s14 = int_to_ptr.vmem [resolvable:$true] %s46_s14 }
   0x5   :  { %s2093_s15 = scalar_lea.vmem %s47_s14, 2048  ;;  %p2098_p1 = scmp.lt.s32.totalorder %s47_s14, %s47_s14 }
   0x6   :  { %p2094_p0 = scmp.ne.s32.totalorder %s47_s14, %s2093_s15  ;;  %p2099_p2 = scmp.lt.s32.totalorder %s2093_s15, %s2093_s15 }
   0x8   :  { %p2100_p3 = por %p2099_p2, %p2098_p1 }
   0xa   :  { %p2101_p4 = pnand %p2100_p3, %p2094_p0 }
   0xc   :  { %2104 = shalt.err (!%p2101_p4)
}
   0xd   :  { %s2194_s16 = smov 128   ;;  %s2195_s17 = smov 8  }
   0xe   :  { %52 = dma.hbm_to_vmem [thread:$0]  %s2918_s6, 2048, %s47_s14, [#allocation6], %s2194_s16, %s2194_s16, %s2195_s17  }
   0xf   :  { %s2196_s20 = smov [#allocation2]  }
  0x10   :  { %s32_s21 = sshll.u32 %s2196_s20, 4  ;;  %s33_s21 = int_to_ptr.vmem [resolvable:$true] %s32_s21 }
  0x11   :  { %s2113_s22 = scalar_lea.vmem %s33_s21, 6144  ;;  %p2118_p6 = scmp.lt.s32.totalorder %s33_s21, %s33_s21 }
  0x12   :  { %p2114_p5 = scmp.ne.s32.totalorder %s33_s21, %s2113_s22  ;;  %p2119_p7 = scmp.lt.s32.totalorder %s2113_s22, %s2113_s22 }
  0x14   :  { %p2120_p8 = por %p2119_p7, %p2118_p6 }
  0x16   :  { %p2121_p9 = pnand %p2120_p8, %p2114_p5 }
  0x18   :  { %2124 = shalt.err (!%p2121_p9)
}
  0x19   :  { %s2197_s23 = smov 384   ;;  %s2198_s24 = smov 24  }
  0x1a   :  { %38 = dma.hbm_to_vmem [thread:$0]  %s2916_s4, 6144, %s33_s21, [#allocation3], %s2197_s23, %s2197_s23, %s2198_s24  }
  0x1b   :  { %s2199_s27 = smov [#allocation7]   ;;  %s2200_s29 = smov [#allocation8]  }
  0x1c   :  { %s58_s28 = sshll.u32 %s2199_s27, 4  ;;  %s70_s6 = sshll.u32 %s2200_s29, 4  ;;  %s59_s28 = int_to_ptr.vmem [resolvable:$true] %s58_s28  ;;  %s71_s6 = int_to_ptr.vmem [resolvable:$true] %s70_s6 }
  0x1d   :  { %s2133_s30 = scalar_lea.vmem %s59_s28, 2048  ;;  %p2138_p11 = scmp.lt.s32.totalorder %s59_s28, %s59_s28 }
  0x1e   :  { %p2134_p10 = scmp.ne.s32.totalorder %s59_s28, %s2133_s30  ;;  %p2139_p12 = scmp.lt.s32.totalorder %s2133_s30, %s2133_s30 }
  0x20   :  { %p2140_p13 = por %p2139_p12, %p2138_p11 }
  0x22   :  { %p2141_p0 = pnand %p2140_p13, %p2134_p10 }
  0x24   :  { %2144 = shalt.err (!%p2141_p0)
}
  0x25   :  { %64 = dma.hbm_to_vmem [thread:$0]  %s2919_s7, 2048, %s59_s28, [#allocation6], %s2194_s16, %s2194_s16, %s2195_s17  }
  0x26   :  { %s2153_s4 = scalar_lea.vmem %s71_s6, 2048  ;;  %p2158_p2 = scmp.lt.s32.totalorder %s71_s6, %s71_s6 }
  0x27   :  { %p2154_p1 = scmp.ne.s32.totalorder %s71_s6, %s2153_s4  ;;  %p2159_p3 = scmp.lt.s32.totalorder %s2153_s4, %s2153_s4 }
  0x29   :  { %p2160_p4 = por %p2159_p3, %p2158_p2 }
  0x2b   :  { %p2161_p5 = pnand %p2160_p4, %p2154_p1 }
  0x2d   :  { %2164 = shalt.err (!%p2161_p5)
}
  0x2e   :  { %76 = dma.hbm_to_vmem [thread:$0]  %s2920_s8, 2048, %s71_s6, [#allocation9], %s2194_s16, %s2194_s16, %s2195_s17  }
  0x2f   :  { %2185 = dma.done.wait [#allocation3], 6144  }
  0x30   :  { %2186 = vsyncadd [#allocation3], 4294961152 }
  0x31   :  { %2187 = dma.done.wait [#allocation6], 4096  }
  0x32   :  { %2188 = vsyncadd [#allocation6], 4294963200 }
  0x33   :  { %2189 = dma.done.wait [#allocation9], 2048  }
  0x34   :  { %2190 = vsyncadd [#allocation9], 4294965248  ;;  %v2923_v0 = vmov 0.0   ;;  %v2202_v1 = vmov 0   ;;  %v2282_v2 = vld [vmem:[#allocation2 + $0x170] sm:$0xff]  ;;  %v2284_v3 = vld [vmem:[#allocation2 + $0x168] sm:$0xff] }
  0x35   :  { %222 = vmatprep.mubr.f32.mxu0 %v2923_v0  ;;  %2083 = vset.pattern.permute.xlu0 %v2202_v1  ;;  %v2286_v4 = vld [vmem:[#allocation2 + $0x158] sm:$0xff]  ;;  %v2289_v5 = vld [vmem:[#allocation2 + $0x150] sm:$0xff]  ;;  %v2292_v6 = vld [vmem:[#allocation2 + $0x140] sm:$0xff]  ;;  %vm312_vm0 = vcmask 130048  }
  0x36   :  { %158 = vmatprep.subr.mxu0 %v2282_v2  ;;  %v2295_v7 = vld [vmem:[#allocation2 + $0x138] sm:$0xff]  ;;  %v2298_v8 = vld [vmem:[#allocation2 + $0x128] sm:$0xff]  ;;  %v2301_v9 = vld [vmem:[#allocation2 + $0x120] sm:$0xff] }
  0x37   :  { %159 = vmatpush1.msra.mxu0 %v2284_v3  ;;  %v2304_v10 = vld [vmem:[#allocation2 + $0x110] sm:$0xff]  ;;  %v2307_v11 = vld [vmem:[#allocation2 + $0x108] sm:$0xff]  ;;  %v2310_v12 = vld [vmem:[#allocation2 + $0xf8] sm:$0xff] }
  0x38   :  { %160 = vmatprep.subr.mxu0 %v2286_v4  ;;  %v2313_v13 = vld [vmem:[#allocation2 + $0xf0] sm:$0xff]  ;;  %v2316_v14 = vld [vmem:[#allocation2 + $0xe0] sm:$0xff]  ;;  %v2324_v16 = vld [vmem:[#allocation2 + $0xd8] sm:$0xff] }
  0x39   :  { %161 = vmatpush1.msra.mxu0 %v2289_v5  ;;  %v2321_v15 = vld [vmem:[%s2912_s0] sm:$0xff]  ;;  %v2333_v18 = vld [vmem:[#allocation2 + $0xc8] sm:$0xff]  ;;  %v2336_v19 = vld [vmem:[#allocation2 + $0x178] sm:$0xff] }
  0x3a   :  { %162 = vmatprep.subr.mxu0 %v2292_v6  ;;  %v2329_v17 = vld [vmem:[%s2913_s1] sm:$0xff]  ;;  %1796 = vmatprep.mubr.f32.mxu1 %v2321_v15  ;;  %v2346_v22 = vld [vmem:[%s2913_s1 + $0x8] sm:$0xff]  ;;  %v2350_v23 = vld [vmem:[#allocation2 + $0xb0] sm:$0xff] }
  0x3b   :  { %163 = vmatpush1.msra.mxu0 %v2295_v7  ;;  %408 = vxpose.xlu1.b32.start [1/2] (short) (narrow) %v2329_v17, 16  ;;  %v2338_v20 = vld [vmem:[#allocation2 + $0x160] sm:$0xff]  ;;  %v2354_v24 = vld [vmem:[#allocation2 + $0xa8] sm:$0xff]  ;;  %v2360_v26 = vld [vmem:[#allocation2 + $0x98] sm:$0xff] }
  0x3c   :  { %164 = vmatprep.subr.mxu0 %v2298_v8  ;;  %v2341_v21 = vld [vmem:[#allocation2 + $0xc0] sm:$0xff]  ;;  %1764 = vmatprep.subr.mxu1 %v2336_v19  ;;  %v2357_v25 = vld [vmem:[#allocation2 + $0x148] sm:$0xff]  ;;  %v2364_v27 = vld [vmem:[#allocation2 + $0x90] sm:$0xff] }
  0x3d   :  { %165 = vmatpush1.msra.mxu0 %v2301_v9  ;;  %1765 = vmatpush3.msra.mxu1 %v2336_v19  ;;  %v2367_v28 = vld [vmem:[#allocation2 + $0x130] sm:$0xff]  ;;  %v2370_v29 = vld [vmem:[#allocation2 + $0x80] sm:$0xff]  ;;  %v2374_v30 = vld [vmem:[#allocation2 + $0x78] sm:$0xff] }
  0x3e   :  { %166 = vmatprep.subr.mxu0 %v2304_v10  ;;  %1766 = vmatprep.subr.mxu1 %v2338_v20  ;;  %v2377_v31 = vld [vmem:[#allocation2 + $0x118] sm:$0xff]  ;;  %v2380_v32 = vld [vmem:[#allocation2 + $0x68] sm:$0xff]  ;;  %v2384_v33 = vld [vmem:[#allocation2 + $0x60] sm:$0xff] }
  0x3f   :  { %167 = vmatpush1.msra.mxu0 %v2307_v11  ;;  %409 = vxpose.xlu1.b32.end [2/2] (short) (narrow) %v2346_v22, 16  ;;  %v2387_v34 = vld [vmem:[#allocation2 + $0x100] sm:$0xff]  ;;  %v2390_v35 = vld [vmem:[#allocation2 + $0x50] sm:$0xff]  ;;  %v2394_v36 = vld [vmem:[#allocation2 + $0x48] sm:$0xff] }
  0x40   :  { %168 = vmatprep.subr.mxu0 %v2310_v12  ;;  %1767 = vmatpush3.msra.mxu1 %v2338_v20  ;;  %v2397_v37 = vld [vmem:[#allocation2 + $0xe8] sm:$0xff]  ;;  %v2400_v38 = vld [vmem:[#allocation2 + $0x38] sm:$0xff]  ;;  %v2404_v39 = vld [vmem:[#allocation2 + $0x30] sm:$0xff] }
  0x41   :  { %169 = vmatpush1.msra.mxu0 %v2313_v13  ;;  %1768 = vmatprep.subr.mxu1 %v2357_v25  ;;  %v2407_v40 = vld [vmem:[#allocation2 + $0xd0] sm:$0xff]  ;;  %v2410_v41 = vld [vmem:[#allocation2 + $0x20] sm:$0xff]  ;;  %v2414_v42 = vld [vmem:[#allocation2 + $0x18] sm:$0xff] }
  0x42   :  { %170 = vmatprep.subr.mxu0 %v2316_v14  ;;  %1769 = vmatpush3.msra.mxu1 %v2357_v25  ;;  %v2417_v43 = vld [vmem:[#allocation2 + $0xb8] sm:$0xff]  ;;  %v2420_v44 = vld [vmem:[#allocation2 + $0x8] sm:$0xff]  ;;  %v2424_v45 = vld [vmem:[#allocation2] sm:$0xff] }
  0x43   :  { %171 = vmatpush1.msra.mxu0 %v2324_v16  ;;  %1770 = vmatprep.subr.mxu1 %v2367_v28  ;;  %v2427_v46 = vld [vmem:[#allocation2 + $0xa0] sm:$0xff]  ;;  %v2433_v47 = vld [vmem:[#allocation2 + $0x88] sm:$0xff]  ;;  %v2442_v49 = vld [vmem:[#allocation2 + $0x70] sm:$0xff] }
  0x44   :  { %172 = vmatprep.subr.mxu0 %v2333_v18  ;;  %1771 = vmatpush3.msra.mxu1 %v2367_v28  ;;  %v394_v48 = vld [vmem:[%s2914_s2] sm:$0xff]  ;;  %v92_v50 = vld [vmem:[%s2912_s0 + $0x8] sm:$0xff]  ;;  %v2450_v51 = vld [vmem:[#allocation2 + $0x58] sm:$0xff] }
  0x45   :  { %173 = vmatpush1.msra.mxu0 %v2341_v21  ;;  %1772 = vmatprep.subr.mxu1 %v2377_v31  ;;  %v395_v52 = vld [vmem:[%s2914_s2 + $0x8] sm:$0xff]  ;;  %v2457_v53 = vld [vmem:[#allocation2 + $0x40] sm:$0xff]  ;;  %v2465_v55 = vld [vmem:[#allocation2 + $0x10] sm:$0xff] }
  0x46   :  { %174 = vmatprep.subr.mxu0 %v2350_v23  ;;  %1773 = vmatpush3.msra.mxu1 %v2377_v31  ;;  %v2461_v54 = vld [vmem:[#allocation2 + $0x28] sm:$0xff]  ;;  %3022 = vst [vmem:[#allocation15_spill] sm:$0xff] %v2465_v55  ;;  %v521_v56 = vld [vmem:[%s2915_s3] sm:$0xff]  ;;  %v2483_v58 = vld [vmem:[%s2913_s1 + $0x10] sm:$0xff] }
  0x47   :  { %175 = vmatpush1.msra.mxu0 %v2354_v24  ;;  %1774 = vmatprep.subr.mxu1 %v2387_v34  ;;  %v522_v57 = vld [vmem:[%s2915_s3 + $0x8] sm:$0xff]  ;;  %3023 = vst [vmem:[#allocation16_spill] sm:$0xff] %v2483_v58  ;;  %v2489_v59 = vld [vmem:[%s2913_s1 + $0x18] sm:$0xff]  ;;  %v2496_v61 = vld [vmem:[#allocation5 + $0x70] sm:$0xff] }
  0x48   :  { %176 = vmatprep.subr.mxu0 %v2360_v26  ;;  %1775 = vmatpush3.msra.mxu1 %v2387_v34  ;;  %3024 = vst [vmem:[#allocation17_spill] sm:$0xff] %v2489_v59  ;;  %v2492_v60 = vld [vmem:[#allocation5 + $0x78] sm:$0xff]  ;;  %3026 = vst [vmem:[#allocation19_spill] sm:$0xff] %v2496_v61  ;;  %v2500_v62 = vld [vmem:[#allocation5 + $0x68] sm:$0xff] }
  0x49   :  { %177 = vmatpush1.msra.mxu0 %v2364_v27  ;;  %1776 = vmatprep.subr.mxu1 %v2397_v37  ;;  %3025 = vst [vmem:[#allocation18_spill] sm:$0xff] %v2492_v60  ;;  %3027 = vst [vmem:[#allocation20_spill] sm:$0xff] %v2500_v62  ;;  %v2503_v63 = vld [vmem:[#allocation5 + $0x60] sm:$0xff] }
  0x4a   :  { %178 = vmatprep.subr.mxu0 %v2370_v29  ;;  %1777 = vmatpush3.msra.mxu1 %v2397_v37  ;;  %3028 = vst [vmem:[#allocation21_spill] sm:$0xff] %v2503_v63 }
  0x4b   :  { %179 = vmatpush1.msra.mxu0 %v2374_v30  ;;  %1778 = vmatprep.subr.mxu1 %v2407_v40 }
  0x4c   :  { %180 = vmatprep.subr.mxu0 %v2380_v32  ;;  %1779 = vmatpush3.msra.mxu1 %v2407_v40 }
  0x4d   :  { %181 = vmatpush1.msra.mxu0 %v2384_v33  ;;  %1780 = vmatprep.subr.mxu1 %v2417_v43 }
  0x4e   :  { %182 = vmatprep.subr.mxu0 %v2390_v35  ;;  %1781 = vmatpush3.msra.mxu1 %v2417_v43 }
  0x4f   :  { %183 = vmatpush1.msra.mxu0 %v2394_v36  ;;  %1782 = vmatprep.subr.mxu1 %v2427_v46 }
  0x50   :  { %184 = vmatprep.subr.mxu0 %v2400_v38  ;;  %1783 = vmatpush3.msra.mxu1 %v2427_v46 }
  0x51   :  { %185 = vmatpush1.msra.mxu0 %v2404_v39  ;;  %1784 = vmatprep.subr.mxu1 %v2433_v47 }
  0x52   :  { %186 = vmatprep.subr.mxu0 %v2410_v41  ;;  %1785 = vmatpush3.msra.mxu1 %v2433_v47 }
  0x53   :  { %187 = vmatpush1.msra.mxu0 %v2414_v42  ;;  %398 = vperm.xlu0 %2083, %v394_v48   ;;  %v2519_v48 = vld [vmem:[#allocation5 + $0x40] sm:$0xff] }
  0x54   :  { %188 = vmatprep.subr.mxu0 %v2420_v44  ;;  %1786 = vmatprep.subr.mxu1 %v2442_v49  ;;  %3032 = vst [vmem:[#allocation25_spill] sm:$0xff] %v2519_v48 }
  0x55   :  { %189 = vmatpush1.msra.mxu0 %v2424_v45  ;;  %1787 = vmatpush3.msra.mxu1 %v2442_v49 }
  0x56   :  { %223 = vmatmul.mubr.f32.vlgmr.msra.gmra.mxu0 %v2321_v15  ;;  %1788 = vmatprep.subr.mxu1 %v2450_v51  ;;  %v2511_v15 = vld [vmem:[#allocation5 + $0x50] sm:$0xff] }
  0x57   :  { %228 = vmatprep.mubr.f32.mxu0 %v2923_v0  ;;  %1789 = vmatpush3.msra.mxu1 %v2450_v51  ;;  %3030 = vst [vmem:[#allocation23_spill] sm:$0xff] %v2511_v15  ;;  %v2539_v0 = vld [vmem:[#allocation5 + $0x18] sm:$0xff] }
  0x58   :  { %403 = vperm.xlu0 %2083, %v395_v52   ;;  %1790 = vmatprep.subr.mxu1 %v2457_v53  ;;  %v2527_v52 = vld [vmem:[#allocation5 + $0x30] sm:$0xff]  ;;  %3037 = vst [vmem:[#allocation30_spill] sm:$0xff] %v2539_v0 }
  0x59   :  { %1791 = vmatpush3.msra.mxu1 %v2457_v53  ;;  %1848 = vmatprep.subr.mxu0 %v2492_v60  ;;  %3034 = vst [vmem:[#allocation27_spill] sm:$0xff] %v2527_v52 }
  0x5a   :  { %229 = vmatmul.mubr.f32.gmra.mxu0 %v92_v50  ;;  %1792 = vmatprep.subr.mxu1 %v2461_v54 }
  0x5b   :  { %1793 = vmatpush3.msra.mxu1 %v2461_v54  ;;  %1849 = vmatpush3.msra.mxu0 %v2492_v60 }
  0x5c   :  { %1794 = vmatprep.subr.mxu1 %v2465_v55  ;;  %525 = vperm.xlu0 %2083, %v521_v56   ;;  %v2531_v56 = vld [vmem:[#allocation5 + $0x28] sm:$0xff] }
  0x5d   :  { %1795 = vmatpush3.msra.mxu1 %v2465_v55  ;;  %2084 = vset.pattern.permute.xlu1 %v2202_v1  ;;  %v2507_v1 = vld [vmem:[#allocation5 + $0x58] sm:$0xff]  ;;  %3035 = vst [vmem:[#allocation28_spill] sm:$0xff] %v2531_v56 }
  0x5e   :  { %1797 = vmatmul.mubr.f32.vlgmr.msra.gmra.mxu1 %v92_v50  ;;  %530 = vperm.xlu1 %2084, %v522_v57   ;;  %3029 = vst [vmem:[#allocation22_spill] sm:$0xff] %v2507_v1  ;;  %v2523_v50 = vld [vmem:[#allocation5 + $0x38] sm:$0xff]  ;;  %v2535_v57 = vld [vmem:[#allocation5 + $0x20] sm:$0xff] }
  0x5f   :  { %1803 = vmatprep.mubr.msk.f32.mxu1 %vm312_vm0, %v2329_v17  ;;  %1850 = vmatprep.subr.mxu0 %v2496_v61  ;;  %v2515_v17 = vld [vmem:[#allocation5 + $0x48] sm:$0xff]  ;;  %3033 = vst [vmem:[#allocation26_spill] sm:$0xff] %v2523_v50  ;;  %3036 = vst [vmem:[#allocation29_spill] sm:$0xff] %v2535_v57 }
  0x60   :  { %1851 = vmatpush3.msra.mxu0 %v2496_v61  ;;  %3031 = vst [vmem:[#allocation24_spill] sm:$0xff] %v2515_v17 }
  0x61   :  { %1852 = vmatprep.subr.mxu0 %v2500_v62 }
  0x62   :  { %1853 = vmatpush3.msra.mxu0 %v2500_v62 }
  0x63   :  { %1854 = vmatprep.subr.mxu0 %v2503_v63 }
  0x64   :  { %1855 = vmatpush3.msra.mxu0 %v2503_v63 }
  0x65   :  { %1856 = vmatprep.subr.mxu0 %v2507_v1 }
  0x66   :  { %1857 = vmatpush3.msra.mxu0 %v2507_v1 }
  0x67   :  { %1858 = vmatprep.subr.mxu0 %v2511_v15 }
  0x68   :  { %1859 = vmatpush3.msra.mxu0 %v2511_v15 }
  0x69   :  { %1860 = vmatprep.subr.mxu0 %v2515_v17 }
  0x6a   :  { %1861 = vmatpush3.msra.mxu0 %v2515_v17 }
  0x6b   :  { %1862 = vmatprep.subr.mxu0 %v2519_v48 }
  0x6c   :  { %1863 = vmatpush3.msra.mxu0 %v2519_v48 }
  0x6d   :  { %1864 = vmatprep.subr.mxu0 %v2523_v50 }
  0x6e   :  { %1865 = vmatpush3.msra.mxu0 %v2523_v50 }
  0x6f   :  { %1866 = vmatprep.subr.mxu0 %v2527_v52 }
  0x70   :  { %1867 = vmatpush3.msra.mxu0 %v2527_v52  ;;  %v1601_v52 = vld [vmem:[%s2915_s3 + $0x10] sm:$0xff] }
  0x71   :  { %1868 = vmatprep.subr.mxu0 %v2531_v56 }
  0x72   :  { %1869 = vmatpush3.msra.mxu0 %v2531_v56  ;;  %v143_v56 = vlaneseq }
  0x73   :  { %1870 = vmatprep.subr.mxu0 %v2535_v57 }
  0x74   :  { %1871 = vmatpush3.msra.mxu0 %v2535_v57  ;;  %v2551_v50 = vshrl.u32 %v143_v56, 7 }
  0x75   :  { %1872 = vmatprep.subr.mxu0 %v2539_v0 }
  0x76   :  { %1873 = vmatpush3.msra.mxu0 %v2539_v0  ;;  %v2959_v57 = vsub.s32 0, %v2551_v50  ;;  %v141_v0 = vld [vmem:[%s2917_s5] sm:$0x7]  ;;  %v2958_v1 = vsub.s32 1, %v2551_v50  ;;  %v2957_v60 = vsub.s32 2, %v2551_v50 }
  0x78   :  { %v146_v15 = vrot.slane %v141_v0, %v2959_v57  ;;  %v150_v56 = vrot.slane %v141_v0, %v2958_v1  ;;  %v2615_v1 = vld [vmem:[#allocation7 + $0x18] sm:$0xff]  ;;  %v2619_v57 = vld [vmem:[#allocation7 + $0x10] sm:$0xff] }
  0x79   :  { %3050 = vst [vmem:[#allocation43_spill] sm:$0xff] %v2615_v1  ;;  %3051 = vst [vmem:[#allocation44_spill] sm:$0xff] %v2619_v57 }
  0x7a   :  { %1146 = vxpose.xlu0.b32.start [1/2] (short) (narrow) %v2483_v58, 16 }
  0x7e   :  { %1147 = vxpose.xlu0.b32.end [2/2] (short) (narrow) %v2489_v59, 16  ;;  %v2544_v59 = vld [vmem:[#allocation5 + $0x10] sm:$0xff] }
  0x7f   :  { %3038 = vst [vmem:[#allocation31_spill] sm:$0xff] %v2544_v59  ;;  %1874 = vmatprep.subr.mxu0 %v2544_v59 }
  0x80   :  { %1875 = vmatpush3.msra.mxu0 %v2544_v59 }
  0xa7   :  { %1264 = vperm.xlu0 %2083, %v1601_v52  }
  0xb7   :  { %v424_v52 = vpop.trf.xlu1 }
 0x116   :  { %v224_v48 = vpop.f32.mrf.mxu0 }
 0x117   :  { %v225_v61 = vadd.f32 %v224_v48, %v146_v15  ;;  %v154_v48 = vrot.slane %v141_v0, %v2957_v60  ;;  %v2579_v0 = vld [vmem:[#allocation7 + $0x60] sm:$0xff] }
 0x118   :  { %v226_v17 = vpop.f32.mrf.mxu0  ;;  %3041 = vst [vmem:[#allocation34_spill] sm:$0xff] %v2579_v0  ;;  %v2611_v60 = vld [vmem:[#allocation7 + $0x20] sm:$0xff] }
 0x119   :  { %v227_v55 = vadd.f32 %v226_v17, %v150_v56  ;;  %v2587_v17 = vld [vmem:[#allocation7 + $0x50] sm:$0xff]  ;;  %3049 = vst [vmem:[#allocation42_spill] sm:$0xff] %v2611_v60 }
 0x11a   :  { %v230_v63 = vpop.f32.mrf.mxu0  ;;  %3043 = vst [vmem:[#allocation36_spill] sm:$0xff] %v2587_v17 }
 0x11b   :  { %v231_v62 = vadd.f32 %v230_v63, %v146_v15  ;;  %v425_v63 = vpop.trf.xlu1  ;;  %v2566_v15 = vld [vmem:[#allocation7 + $0x78] sm:$0xff] }
 0x11c   :  { %v232_v59 = vpop.f32.mrf.mxu0 }
 0x11d   :  { %1799 = vmatprep.subr.mxu1 %v231_v62  ;;  %v233_v58 = vadd.f32 %v232_v59, %v150_v56  ;;  %v2570_v59 = vld [vmem:[#allocation7 + $0x70] sm:$0xff]  ;;  %v2595_v56 = vld [vmem:[#allocation7 + $0x40] sm:$0xff] }
 0x11e   :  { %1800 = vmatpush3.msra.mxu1 %v231_v62  ;;  %v1798_v62 = vpop.f32.mrf.mxu1  ;;  %3039 = vst [vmem:[#allocation32_spill] sm:$0xff] %v2570_v59  ;;  %3045 = vst [vmem:[#allocation38_spill] sm:$0xff] %v2595_v56 }
 0x11f   :  { %1801 = vmatprep.subr.mxu1 %v225_v61 }
 0x120   :  { %1802 = vmatpush3.msra.mxu1 %v225_v61 }
 0x121   :  { %1804 = vmatmul.mubr.msk.f32.vlgmr.msra.gmra.mxu1 %vm312_vm0, %v2346_v22  ;;  %1806 = vmatprep.subr.mxu1 %v233_v58  ;;  %v301_v22 = vpop.f32.mrf.mxu1 }
 0x122   :  { %1807 = vmatpush3.msra.mxu1 %v233_v58  ;;  %1810 = vmatprep.mubr.msk.f32.mxu1 %vm312_vm0, %v424_v52  ;;  %v2575_v58 = vld [vmem:[#allocation7 + $0x68] sm:$0xff]  ;;  %v302_v61 = vadd.f32 %v301_v22, %v154_v48  ;;  %v2603_v22 = vld [vmem:[#allocation7 + $0x30] sm:$0xff] }
 0x123   :  { %1808 = vmatprep.subr.mxu1 %v227_v55  ;;  %3040 = vst [vmem:[#allocation33_spill] sm:$0xff] %v2575_v58  ;;  %v2591_v52 = vld [vmem:[#allocation7 + $0x48] sm:$0xff]  ;;  %3047 = vst [vmem:[#allocation40_spill] sm:$0xff] %v2603_v22 }
 0x124   :  { %1809 = vmatpush3.msra.mxu1 %v227_v55  ;;  %v2583_v55 = vld [vmem:[#allocation7 + $0x58] sm:$0xff]  ;;  %3044 = vst [vmem:[#allocation37_spill] sm:$0xff] %v2591_v52 }
 0x125   :  { %1811 = vmatmul.mubr.msk.f32.vlgmr.msra.gmra.mxu1 %vm312_vm0, %v425_v63  ;;  %1813 = vmatprep.subr.mxu1 %v2566_v15  ;;  %3042 = vst [vmem:[#allocation35_spill] sm:$0xff] %v2583_v55  ;;  %v2599_v63 = vld [vmem:[#allocation7 + $0x38] sm:$0xff] }
 0x126   :  { %1814 = vmatpush3.msra.mxu1 %v2566_v15  ;;  %1845 = vmatprep.mubr.f32.mxu1 %v302_v61  ;;  %3046 = vst [vmem:[#allocation39_spill] sm:$0xff] %v2599_v63  ;;  %v2607_v61 = vld [vmem:[#allocation7 + $0x28] sm:$0xff] }
 0x127   :  { %1815 = vmatprep.subr.mxu1 %v2570_v59  ;;  %3048 = vst [vmem:[#allocation41_spill] sm:$0xff] %v2607_v61 }
 0x128   :  { %1816 = vmatpush3.msra.mxu1 %v2570_v59 }
 0x129   :  { %1817 = vmatprep.subr.mxu1 %v2575_v58 }
 0x12a   :  { %1818 = vmatpush3.msra.mxu1 %v2575_v58 }
 0x12b   :  { %1819 = vmatprep.subr.mxu1 %v2579_v0 }
 0x12c   :  { %1820 = vmatpush3.msra.mxu1 %v2579_v0 }
 0x12d   :  { %1821 = vmatprep.subr.mxu1 %v2583_v55 }
 0x12e   :  { %1822 = vmatpush3.msra.mxu1 %v2583_v55 }
 0x12f   :  { %1823 = vmatprep.subr.mxu1 %v2587_v17 }
 0x130   :  { %1824 = vmatpush3.msra.mxu1 %v2587_v17 }
 0x131   :  { %1825 = vmatprep.subr.mxu1 %v2591_v52 }
 0x132   :  { %1826 = vmatpush3.msra.mxu1 %v2591_v52  ;;  %v531_v52 = vpop.permute.xlu1 %530 }
 0x133   :  { %1827 = vmatprep.subr.mxu1 %v2595_v56 }
 0x134   :  { %1828 = vmatpush3.msra.mxu1 %v2595_v56 }
 0x135   :  { %1829 = vmatprep.subr.mxu1 %v2599_v63 }
 0x136   :  { %1830 = vmatpush3.msra.mxu1 %v2599_v63  ;;  %v2623_v63 = vld [vmem:[#allocation7 + $0x8] sm:$0xff] }
 0x137   :  { %1831 = vmatprep.subr.mxu1 %v2603_v22  ;;  %3052 = vst [vmem:[#allocation45_spill] sm:$0xff] %v2623_v63 }
 0x138   :  { %1832 = vmatpush3.msra.mxu1 %v2603_v22  ;;  %v2627_v22 = vld [vmem:[#allocation7] sm:$0xff] }
 0x139   :  { %1833 = vmatprep.subr.mxu1 %v2607_v61  ;;  %3053 = vst [vmem:[#allocation46_spill] sm:$0xff] %v2627_v22 }
 0x13a   :  { %1834 = vmatpush3.msra.mxu1 %v2607_v61  ;;  %v307_v61 = vadd.f32 %v1798_v62, %v154_v48  ;;  %v2643_v48 = vld [vmem:[#allocation8 + $0x60] sm:$0xff]  ;;  %v2647_v62 = vld [vmem:[#allocation8 + $0x58] sm:$0xff] }
 0x13b   :  { %1835 = vmatprep.subr.mxu1 %v2611_v60  ;;  %3057 = vst [vmem:[#allocation50_spill] sm:$0xff] %v2643_v48  ;;  %3058 = vst [vmem:[#allocation51_spill] sm:$0xff] %v2647_v62 }
 0x13c   :  { %1836 = vmatpush3.msra.mxu1 %v2611_v60  ;;  %v2631_v60 = vld [vmem:[#allocation8 + $0x78] sm:$0xff] }
 0x13d   :  { %1837 = vmatprep.subr.mxu1 %v2615_v1  ;;  %3054 = vst [vmem:[#allocation47_spill] sm:$0xff] %v2631_v60 }
 0x13e   :  { %1838 = vmatpush3.msra.mxu1 %v2615_v1  ;;  %v2635_v1 = vld [vmem:[#allocation8 + $0x70] sm:$0xff] }
 0x13f   :  { %1839 = vmatprep.subr.mxu1 %v2619_v57  ;;  %3055 = vst [vmem:[#allocation48_spill] sm:$0xff] %v2635_v1 }
 0x140   :  { %1840 = vmatpush3.msra.mxu1 %v2619_v57  ;;  %v2639_v57 = vld [vmem:[#allocation8 + $0x68] sm:$0xff] }
 0x141   :  { %1841 = vmatprep.subr.mxu1 %v2623_v63  ;;  %3056 = vst [vmem:[#allocation49_spill] sm:$0xff] %v2639_v57 }
 0x142   :  { %1842 = vmatpush3.msra.mxu1 %v2623_v63 }
 0x143   :  { %1843 = vmatprep.subr.mxu1 %v2627_v22 }
 0x144   :  { %1844 = vmatpush3.msra.mxu1 %v2627_v22 }
 0x145   :  { %1883 = vmatprep.subr.mxu1 %v2631_v60  ;;  %1846 = vmatmul.mubr.f32.vlgmr.msra.gmra.mxu1 %v307_v61  ;;  %v2651_v61 = vld [vmem:[#allocation8 + $0x50] sm:$0xff] }
 0x146   :  { %1884 = vmatpush3.msra.mxu1 %v2631_v60  ;;  %3059 = vst [vmem:[#allocation52_spill] sm:$0xff] %v2651_v61  ;;  %v2655_v60 = vld [vmem:[#allocation8 + $0x48] sm:$0xff] }
 0x147   :  { %1885 = vmatprep.subr.mxu1 %v2635_v1  ;;  %3060 = vst [vmem:[#allocation53_spill] sm:$0xff] %v2655_v60 }
 0x148   :  { %1886 = vmatpush3.msra.mxu1 %v2635_v1  ;;  %v2659_v1 = vld [vmem:[#allocation8 + $0x40] sm:$0xff] }
 0x149   :  { %1887 = vmatprep.subr.mxu1 %v2639_v57  ;;  %3061 = vst [vmem:[#allocation54_spill] sm:$0xff] %v2659_v1 }
 0x14a   :  { %1888 = vmatpush3.msra.mxu1 %v2639_v57  ;;  %v2663_v57 = vld [vmem:[#allocation8 + $0x38] sm:$0xff] }
 0x14b   :  { %1889 = vmatprep.subr.mxu1 %v2643_v48  ;;  %3062 = vst [vmem:[#allocation55_spill] sm:$0xff] %v2663_v57 }
 0x14c   :  { %1890 = vmatpush3.msra.mxu1 %v2643_v48  ;;  %v2667_v48 = vld [vmem:[#allocation8 + $0x30] sm:$0xff] }
 0x14d   :  { %1891 = vmatprep.subr.mxu1 %v2647_v62  ;;  %3063 = vst [vmem:[#allocation56_spill] sm:$0xff] %v2667_v48 }
 0x14e   :  { %1892 = vmatpush3.msra.mxu1 %v2647_v62  ;;  %v2671_v62 = vld [vmem:[#allocation8 + $0x28] sm:$0xff] }
 0x14f   :  { %1893 = vmatprep.subr.mxu1 %v2651_v61  ;;  %3064 = vst [vmem:[#allocation57_spill] sm:$0xff] %v2671_v62 }
 0x150   :  { %1894 = vmatpush3.msra.mxu1 %v2651_v61  ;;  %v2702_v61 = vld [vmem:[#allocation8] sm:$0xff] }
 0x151   :  { %1895 = vmatprep.subr.mxu1 %v2655_v60  ;;  %3069 = vst [vmem:[#allocation62_spill] sm:$0xff] %v2702_v61 }
 0x152   :  { %1896 = vmatpush3.msra.mxu1 %v2655_v60  ;;  %v2677_v60 = vld [vmem:[#allocation8 + $0x20] sm:$0xff] }
 0x153   :  { %1897 = vmatprep.subr.mxu1 %v2659_v1  ;;  %3065 = vst [vmem:[#allocation58_spill] sm:$0xff] %v2677_v60 }
 0x154   :  { %1898 = vmatpush3.msra.mxu1 %v2659_v1  ;;  %v2680_v1 = vld [vmem:[#allocation5 + $0x8] sm:$0xff] }
 0x155   :  { %1899 = vmatprep.subr.mxu1 %v2663_v57  ;;  %1876 = vmatprep.subr.mxu0 %v2680_v1 }
 0x156   :  { %1900 = vmatpush3.msra.mxu1 %v2663_v57  ;;  %v2684_v57 = vld [vmem:[#allocation8 + $0x18] sm:$0xff]  ;;  %1877 = vmatpush3.msra.mxu0 %v2680_v1 }
 0x157   :  { %1901 = vmatprep.subr.mxu1 %v2667_v48  ;;  %3066 = vst [vmem:[#allocation59_spill] sm:$0xff] %v2684_v57 }
 0x158   :  { %1902 = vmatpush3.msra.mxu1 %v2667_v48  ;;  %v2688_v48 = vld [vmem:[#allocation5] sm:$0xff] }
 0x159   :  { %1903 = vmatprep.subr.mxu1 %v2671_v62  ;;  %1878 = vmatprep.subr.mxu0 %v2688_v48 }
 0x15a   :  { %1904 = vmatpush3.msra.mxu1 %v2671_v62  ;;  %v2692_v62 = vld [vmem:[#allocation8 + $0x10] sm:$0xff]  ;;  %1879 = vmatpush3.msra.mxu0 %v2688_v48 }
 0x15b   :  { %1905 = vmatprep.subr.mxu1 %v2677_v60  ;;  %3067 = vst [vmem:[#allocation60_spill] sm:$0xff] %v2692_v62  ;;  %895 = vmatprep.subr.mxu0 %v2282_v2  ;;  %v1598_v2 = vld [vmem:[%s2914_s2 + $0x18] sm:$0xff] }
 0x15c   :  { %1906 = vmatpush3.msra.mxu1 %v2677_v60  ;;  %v2698_v60 = vld [vmem:[#allocation8 + $0x8] sm:$0xff] }
 0x15d   :  { %1907 = vmatprep.subr.mxu1 %v2684_v57  ;;  %3068 = vst [vmem:[#allocation61_spill] sm:$0xff] %v2698_v60 }
 0x15e   :  { %1908 = vmatpush3.msra.mxu1 %v2684_v57  ;;  %v399_v57 = vpop.permute.xlu0 %398 }
 0x15f   :  { %1909 = vmatprep.subr.mxu1 %v2692_v62 }
 0x160   :  { %1910 = vmatpush3.msra.mxu1 %v2692_v62  ;;  %v1597_v62 = vld [vmem:[%s2914_s2 + $0x10] sm:$0xff] }
 0x161   :  { %1911 = vmatprep.subr.mxu1 %v2698_v60  ;;  %1136 = vperm.xlu1 %2084, %v1597_v62  }
 0x162   :  { %1912 = vmatpush3.msra.mxu1 %v2698_v60  ;;  %v1602_v60 = vld [vmem:[%s2915_s3 + $0x18] sm:$0xff]  ;;  %v404_v22 = vpop.permute.xlu0 %403 }
 0x163   :  { %1913 = vmatprep.subr.mxu1 %v2702_v61 }
 0x164   :  { %1914 = vmatpush3.msra.mxu1 %v2702_v61 }
 0x165   :  { %1918 = vmatprep.subr.mxu1 %v2336_v19  ;;  %1141 = vperm.xlu1 %2084, %v1598_v2   ;;  %v3070_v2 = vmov 0.0  }
 0x166   :  { %v526_v62 = vpop.permute.xlu0 %525 }
 0x169   :  { %1269 = vperm.xlu1 %2084, %v1602_v60  }
 0x1e1   :  { %v1805_v61 = vpop.f32.mrf.mxu1 }
 0x1e2   :  { %v407_v17 = vmul.f32 %v1805_v61, %v404_v22  ;;  %v3093_v22 = vld [vmem:[#allocation34_spill] sm:$0xff]  ;;  %v3095_v61 = vld [vmem:[#allocation36_spill] sm:$0xff] }
 0x1e3   :  { %v385_v63 = vpop.f32.mrf.mxu1 }
 0x1e4   :  { %v406_v56 = vmul.f32 %v399_v57, %v385_v63  ;;  %v3089_v57 = vsub.s32 2, %v2551_v50  ;;  %v3092_v63 = vld [vmem:[#allocation33_spill] sm:$0xff] }
 0x1e5   :  { %v1812_v55 = vpop.f32.mrf.mxu1 }
 0x1e6   :  { %1880 = vmatprep.mubr.f32.mxu0 %v406_v56  ;;  %v534_v58 = vmul.f32 %v1812_v55, %v531_v52 }
 0x1e7   :  { %v512_v0 = vpop.f32.mrf.mxu1  ;;  %1881 = vmatmul.mubr.f32.vlgmr.msra.gmra.mxu0 %v407_v17  ;;  %v3090_v17 = vld [vmem:[#allocation17_spill] sm:$0xff] }
 0x1e8   :  { %v533_v59 = vmul.f32 %v526_v62, %v512_v0  ;;  %896 = vmatpush1.msra.mxu0 %v2284_v3  ;;  %959 = vmatprep.mubr.f32.mxu0 %v3070_v2  ;;  %v1591_v3 = vld [vmem:[%s2912_s0 + $0x10] sm:$0xff]  ;;  %v3097_v62 = vld [vmem:[#allocation38_spill] sm:$0xff] }
 0x1e9   :  { %897 = vmatprep.subr.mxu0 %v2286_v4  ;;  %v1592_v4 = vld [vmem:[%s2912_s0 + $0x18] sm:$0xff] }
 0x1ea   :  { %898 = vmatpush1.msra.mxu0 %v2289_v5  ;;  %1915 = vmatprep.mubr.f32.mxu1 %v533_v59  ;;  %v3071_v5 = vld [vmem:[#allocation15_spill] sm:$0xff] }
 0x1eb   :  { %899 = vmatprep.subr.mxu0 %v2292_v6  ;;  %1916 = vmatmul.mubr.f32.vlgmr.msra.gmra.mxu1 %v534_v58  ;;  %v3072_v6 = vld [vmem:[#allocation16_spill] sm:$0xff] }
 0x1ec   :  { %900 = vmatpush1.msra.mxu0 %v2295_v7  ;;  %1919 = vmatpush3.msra.mxu1 %v2336_v19  ;;  %v3073_v7 = vld [vmem:[#allocation18_spill] sm:$0xff]  ;;  %v3083_v19 = vld [vmem:[#allocation28_spill] sm:$0xff] }
 0x1ed   :  { %901 = vmatprep.subr.mxu0 %v2298_v8  ;;  %1920 = vmatprep.subr.mxu1 %v2338_v20  ;;  %v3074_v8 = vld [vmem:[#allocation19_spill] sm:$0xff] }
 0x1ee   :  { %902 = vmatpush1.msra.mxu0 %v2301_v9  ;;  %1921 = vmatpush3.msra.mxu1 %v2338_v20  ;;  %v3075_v9 = vld [vmem:[#allocation20_spill] sm:$0xff]  ;;  %v3084_v20 = vld [vmem:[#allocation29_spill] sm:$0xff] }
 0x1ef   :  { %903 = vmatprep.subr.mxu0 %v2304_v10  ;;  %1922 = vmatprep.subr.mxu1 %v2357_v25  ;;  %v3076_v10 = vld [vmem:[#allocation21_spill] sm:$0xff] }
 0x1f0   :  { %904 = vmatpush1.msra.mxu0 %v2307_v11  ;;  %1923 = vmatpush3.msra.mxu1 %v2357_v25  ;;  %v3077_v11 = vld [vmem:[#allocation22_spill] sm:$0xff] }
 0x1f1   :  { %905 = vmatprep.subr.mxu0 %v2310_v12  ;;  %1924 = vmatprep.subr.mxu1 %v2367_v28  ;;  %v3078_v12 = vld [vmem:[#allocation23_spill] sm:$0xff] }
 0x1f2   :  { %906 = vmatpush1.msra.mxu0 %v2313_v13  ;;  %1925 = vmatpush3.msra.mxu1 %v2367_v28  ;;  %v3079_v13 = vld [vmem:[#allocation24_spill] sm:$0xff] }
 0x1f3   :  { %907 = vmatprep.subr.mxu0 %v2316_v14  ;;  %1926 = vmatprep.subr.mxu1 %v2377_v31  ;;  %v3080_v14 = vld [vmem:[#allocation25_spill] sm:$0xff] }
 0x1f4   :  { %908 = vmatpush1.msra.mxu0 %v2324_v16  ;;  %1927 = vmatpush3.msra.mxu1 %v2377_v31  ;;  %v3081_v16 = vld [vmem:[#allocation26_spill] sm:$0xff] }
 0x1f5   :  { %909 = vmatprep.subr.mxu0 %v2333_v18  ;;  %1928 = vmatprep.subr.mxu1 %v2387_v34  ;;  %v3082_v18 = vld [vmem:[#allocation27_spill] sm:$0xff] }
 0x1f6   :  { %910 = vmatpush1.msra.mxu0 %v2341_v21  ;;  %1929 = vmatpush3.msra.mxu1 %v2387_v34  ;;  %v3085_v21 = vld [vmem:[#allocation30_spill] sm:$0xff] }
 0x1f7   :  { %911 = vmatprep.subr.mxu0 %v2350_v23  ;;  %1930 = vmatprep.subr.mxu1 %v2397_v37  ;;  %v3086_v23 = vld [vmem:[#allocation31_spill] sm:$0xff] }
 0x1f8   :  { %912 = vmatpush1.msra.mxu0 %v2354_v24  ;;  %1931 = vmatpush3.msra.mxu1 %v2397_v37 }
 0x1f9   :  { %913 = vmatprep.subr.mxu0 %v2360_v26  ;;  %1932 = vmatprep.subr.mxu1 %v2407_v40 }
 0x1fa   :  { %914 = vmatpush1.msra.mxu0 %v2364_v27  ;;  %1933 = vmatpush3.msra.mxu1 %v2407_v40 }
 0x1fb   :  { %915 = vmatprep.subr.mxu0 %v2370_v29  ;;  %1934 = vmatprep.subr.mxu1 %v2417_v43 }
 0x1fc   :  { %916 = vmatpush1.msra.mxu0 %v2374_v30  ;;  %1935 = vmatpush3.msra.mxu1 %v2417_v43  ;;  %v2823_v30 = vld [vmem:[%s2921_s9] ss:$0 sm:$0xff] }
 0x1fd   :  { %917 = vmatprep.subr.mxu0 %v2380_v32  ;;  %1936 = vmatprep.subr.mxu1 %v2427_v46 }
 0x1fe   :  { %918 = vmatpush1.msra.mxu0 %v2384_v33  ;;  %1937 = vmatpush3.msra.mxu1 %v2427_v46 }
 0x1ff   :  { %919 = vmatprep.subr.mxu0 %v2390_v35  ;;  %1938 = vmatprep.subr.mxu1 %v2433_v47 }
 0x200   :  { %920 = vmatpush1.msra.mxu0 %v2394_v36  ;;  %1939 = vmatpush3.msra.mxu1 %v2433_v47 }
 0x201   :  { %921 = vmatprep.subr.mxu0 %v2400_v38  ;;  %1940 = vmatprep.subr.mxu1 %v2442_v49 }
 0x202   :  { %922 = vmatpush1.msra.mxu0 %v2404_v39  ;;  %1941 = vmatpush3.msra.mxu1 %v2442_v49 }
 0x203   :  { %923 = vmatprep.subr.mxu0 %v2410_v41  ;;  %1942 = vmatprep.subr.mxu1 %v2450_v51  ;;  %v878_v41 = vld [vmem:[%s2917_s5] sm:$0x7]  ;;  %s2203_s5 = smov [#allocation10]  }
 0x204   :  { %924 = vmatpush1.msra.mxu0 %v2414_v42  ;;  %1943 = vmatpush3.msra.mxu1 %v2450_v51  ;;  %v891_v59 = vrot.slane %v878_v41, %v3089_v57  ;;  %s1572_s9 = sshll.u32 %s2203_s5, 4  ;;  %s1573_s9 = int_to_ptr.vmem [resolvable:$true] %s1572_s9 }
 0x205   :  { %925 = vmatprep.subr.mxu0 %v2420_v44  ;;  %1944 = vmatprep.subr.mxu1 %v2457_v53  ;;  %v1847_v24 = vpop.f32.mrf.mxu1  ;;  %v3087_v44 = vsub.s32 0, %v2551_v50  ;;  %s2165_s27 = scalar_lea.vmem %s1573_s9, 512  ;;  %p2170_p7 = scmp.lt.s32.totalorder %s1573_s9, %s1573_s9 }
 0x206   :  { %926 = vmatpush1.msra.mxu0 %v2424_v45  ;;  %1945 = vmatpush3.msra.mxu1 %v2457_v53  ;;  %p2166_p6 = scmp.ne.s32.totalorder %s1573_s9, %s2165_s27  ;;  %p2171_p8 = scmp.lt.s32.totalorder %s2165_s27, %s2165_s27 }
 0x207   :  { %960 = vmatmul.mubr.f32.vlgmr.msra.gmra.mxu0 %v1591_v3  ;;  %1946 = vmatprep.subr.mxu1 %v2461_v54  ;;  %v633_v26 = vpop.f32.mrf.mxu1  ;;  %v883_v45 = vrot.slane %v878_v41, %v3087_v44 }
 0x208   :  { %965 = vmatprep.mubr.f32.mxu0 %v3070_v2  ;;  %1947 = vmatpush3.msra.mxu1 %v2461_v54  ;;  %v3088_v54 = vsub.s32 1, %v2551_v50  ;;  %v3091_v50 = vld [vmem:[#allocation32_spill] sm:$0xff]  ;;  %v3098_v2 = vld [vmem:[#allocation39_spill] sm:$0xff]  ;;  %p2172_p9 = por %p2171_p8, %p2170_p7 }
 0x209   :  { %1948 = vmatprep.subr.mxu1 %v3071_v5  ;;  %1950 = vmatprep.mubr.f32.mxu1 %v1591_v3  ;;  %v3099_v3 = vld [vmem:[#allocation40_spill] sm:$0xff] }
 0x20a   :  { %1949 = vmatpush3.msra.mxu1 %v3071_v5  ;;  %v887_v60 = vrot.slane %v878_v41, %v3088_v54  ;;  %v3101_v5 = vld [vmem:[#allocation42_spill] sm:$0xff]  ;;  %p2173_p10 = pnand %p2172_p9, %p2166_p6 }
 0x20b   :  { %966 = vmatmul.mubr.f32.gmra.mxu0 %v1592_v4  ;;  %1951 = vmatmul.mubr.f32.vlgmr.msra.gmra.mxu1 %v1592_v4  ;;  %v3100_v4 = vld [vmem:[#allocation41_spill] sm:$0xff] }
 0x20c   :  { %1957 = vmatprep.mubr.msk.f32.mxu0 %vm312_vm0, %v3072_v6  ;;  %2002 = vmatprep.subr.mxu1 %v3073_v7  ;;  %v3102_v6 = vld [vmem:[#allocation43_spill] sm:$0xff] }
 0x20d   :  { %2003 = vmatpush3.msra.mxu1 %v3073_v7  ;;  %v3103_v7 = vld [vmem:[#allocation44_spill] sm:$0xff] }
 0x20e   :  { %2004 = vmatprep.subr.mxu1 %v3074_v8 }
 0x20f   :  { %2005 = vmatpush3.msra.mxu1 %v3074_v8 }
 0x210   :  { %2006 = vmatprep.subr.mxu1 %v3075_v9 }
 0x211   :  { %2007 = vmatpush3.msra.mxu1 %v3075_v9  ;;  %v3104_v9 = vld [vmem:[#allocation45_spill] sm:$0xff] }
 0x212   :  { %2008 = vmatprep.subr.mxu1 %v3076_v10 }
 0x213   :  { %2009 = vmatpush3.msra.mxu1 %v3076_v10  ;;  %v3105_v10 = vld [vmem:[#allocation46_spill] sm:$0xff] }
 0x214   :  { %2010 = vmatprep.subr.mxu1 %v3077_v11 }
 0x215   :  { %2011 = vmatpush3.msra.mxu1 %v3077_v11  ;;  %v3106_v11 = vld [vmem:[#allocation47_spill] sm:$0xff] }
 0x216   :  { %2012 = vmatprep.subr.mxu1 %v3078_v12 }
 0x217   :  { %2013 = vmatpush3.msra.mxu1 %v3078_v12  ;;  %v3107_v12 = vld [vmem:[#allocation48_spill] sm:$0xff] }
 0x218   :  { %2014 = vmatprep.subr.mxu1 %v3079_v13 }
 0x219   :  { %2015 = vmatpush3.msra.mxu1 %v3079_v13  ;;  %v3108_v13 = vld [vmem:[#allocation49_spill] sm:$0xff] }
 0x21a   :  { %2016 = vmatprep.subr.mxu1 %v3080_v14 }
 0x21b   :  { %2017 = vmatpush3.msra.mxu1 %v3080_v14  ;;  %v3109_v14 = vld [vmem:[#allocation50_spill] sm:$0xff] }
 0x21c   :  { %2018 = vmatprep.subr.mxu1 %v3081_v16 }
 0x21d   :  { %2019 = vmatpush3.msra.mxu1 %v3081_v16  ;;  %v3110_v16 = vld [vmem:[#allocation51_spill] sm:$0xff] }
 0x21e   :  { %2020 = vmatprep.subr.mxu1 %v3082_v18 }
 0x21f   :  { %2021 = vmatpush3.msra.mxu1 %v3082_v18  ;;  %v3111_v18 = vld [vmem:[#allocation52_spill] sm:$0xff] }
 0x220   :  { %2022 = vmatprep.subr.mxu1 %v3083_v19 }
 0x221   :  { %2023 = vmatpush3.msra.mxu1 %v3083_v19  ;;  %v3112_v19 = vld [vmem:[#allocation53_spill] sm:$0xff] }
 0x222   :  { %2024 = vmatprep.subr.mxu1 %v3084_v20 }
 0x223   :  { %2025 = vmatpush3.msra.mxu1 %v3084_v20  ;;  %v3113_v20 = vld [vmem:[#allocation54_spill] sm:$0xff] }
 0x224   :  { %2026 = vmatprep.subr.mxu1 %v3085_v21 }
 0x225   :  { %2027 = vmatpush3.msra.mxu1 %v3085_v21  ;;  %v3114_v21 = vld [vmem:[#allocation55_spill] sm:$0xff] }
 0x226   :  { %2028 = vmatprep.subr.mxu1 %v3086_v23 }
 0x227   :  { %2029 = vmatpush3.msra.mxu1 %v3086_v23  ;;  %v3115_v23 = vld [vmem:[#allocation56_spill] sm:$0xff] }
 0x228   :  { %2030 = vmatprep.subr.mxu1 %v2680_v1 }
 0x229   :  { %2031 = vmatpush3.msra.mxu1 %v2680_v1  ;;  %v1162_v1 = vpop.trf.xlu0 }
 0x22a   :  { %2032 = vmatprep.subr.mxu1 %v2688_v48 }
 0x22b   :  { %2033 = vmatpush3.msra.mxu1 %v2688_v48  ;;  %v3094_v48 = vld [vmem:[#allocation35_spill] sm:$0xff] }
 0x22d   :  { %v1163_v56 = vpop.trf.xlu0 }
 0x2a7   :  { %v1882_v25 = vpop.f32.mrf.mxu0 }
 0x2a8   :  { %v714_v28 = vadd.f32 %v1882_v25, %v1847_v24  ;;  %v3116_v24 = vld [vmem:[#allocation57_spill] sm:$0xff]  ;;  %v3117_v25 = vld [vmem:[#allocation58_spill] sm:$0xff] }
 0x2a9   :  { %v708_v27 = vpop.f32.mrf.mxu0 }
 0x2aa   :  { %v709_v31 = vadd.f32 %v708_v27, %v633_v26  ;;  %v3118_v26 = vld [vmem:[#allocation59_spill] sm:$0xff]  ;;  %v3119_v27 = vld [vmem:[#allocation60_spill] sm:$0xff] }
 0x2ab   :  { %v1917_v29 = vpop.f32.mrf.mxu1 }
 0x2ac   :  { %v809_v32 = vadd.f32 %v1917_v29, %v714_v28  ;;  %v3120_v28 = vld [vmem:[#allocation61_spill] sm:$0xff]  ;;  %v3121_v29 = vld [vmem:[#allocation62_spill] sm:$0xff] }
 0x2ad   :  { %v799_v33 = vpop.f32.mrf.mxu1 }
 0x2ae   :  { %v818_v34 = vadd.f32 %v2823_v30, %v809_v32  ;;  %v808_v35 = vadd.f32 %v799_v33, %v709_v31  ;;  %v1137_v31 = vpop.permute.xlu1 %1136 }
 0x2b0   :  { %vm820_vm1 = vcmp.gt.f32.partialorder %v818_v34, 0.0  ;;  %v822_v36 = vmul.f32 0.1, %v818_v34  ;;  %v817_v37 = vadd.f32 %v2823_v30, %v808_v35 }
 0x2b2   :  { %v824_v38 = vsel %vm820_vm1, %v818_v34, %v822_v36  ;;  %vm819_vm2 = vcmp.gt.f32.partialorder %v817_v37, 0.0  ;;  %v821_v39 = vmul.f32 0.1, %v817_v37  ;;  %v1142_v33 = vpop.permute.xlu1 %1141 }
 0x2b3   :  { %826 = vst [vmem:[#allocation10 + $0x8] sm:$0xff] %v824_v38  ;;  %v1265_v38 = vpop.permute.xlu0 %1264 }
 0x2b4   :  { %v823_v40 = vsel %vm819_vm2, %v817_v37, %v821_v39 }
 0x2b5   :  { %825 = vst [vmem:[#allocation10] sm:$0xff] %v823_v40 }
 0x2b6   :  { %v1270_v40 = vpop.permute.xlu1 %1269 }
 0x2c7   :  { %v961_v42 = vpop.f32.mrf.mxu0 }
 0x2c8   :  { %v962_v53 = vadd.f32 %v961_v42, %v883_v45 }
 0x2c9   :  { %v963_v43 = vpop.f32.mrf.mxu0 }
 0x2ca   :  { %v964_v55 = vadd.f32 %v963_v43, %v887_v60 }
 0x2cb   :  { %v967_v46 = vpop.f32.mrf.mxu0  ;;  %v1952_v49 = vpop.f32.mrf.mxu1 }
 0x2cc   :  { %v968_v47 = vadd.f32 %v967_v46, %v883_v45  ;;  %v1044_v8 = vadd.f32 %v1952_v49, %v891_v59 }
 0x2cd   :  { %v969_v51 = vpop.f32.mrf.mxu0  ;;  %v1038_v0 = vpop.f32.mrf.mxu1 }
 0x2ce   :  { %1953 = vmatprep.subr.mxu0 %v968_v47  ;;  %v970_v58 = vadd.f32 %v969_v51, %v887_v60  ;;  %v1039_v52 = vadd.f32 %v1038_v0, %v891_v59 }
 0x2cf   :  { %1954 = vmatpush3.msra.mxu0 %v968_v47 }
 0x2d0   :  { %1955 = vmatprep.subr.mxu0 %v962_v53 }
 0x2d1   :  { %1956 = vmatpush3.msra.mxu0 %v962_v53 }
 0x2d2   :  { %1958 = vmatmul.mubr.msk.f32.vlgmr.msra.gmra.mxu0 %vm312_vm0, %v3090_v17  ;;  %1960 = vmatprep.subr.mxu0 %v970_v58 }
 0x2d3   :  { %1961 = vmatpush3.msra.mxu0 %v970_v58  ;;  %1964 = vmatprep.mubr.msk.f32.mxu0 %vm312_vm0, %v1162_v1 }
 0x2d4   :  { %1962 = vmatprep.subr.mxu0 %v964_v55 }
 0x2d5   :  { %1963 = vmatpush3.msra.mxu0 %v964_v55 }
 0x2d6   :  { %1965 = vmatmul.mubr.msk.f32.vlgmr.msra.gmra.mxu0 %vm312_vm0, %v1163_v56  ;;  %1967 = vmatprep.subr.mxu0 %v2566_v15 }
 0x2d7   :  { %1968 = vmatpush3.msra.mxu0 %v2566_v15  ;;  %1999 = vmatprep.mubr.f32.mxu0 %v1039_v52  ;;  %v3096_v15 = vld [vmem:[#allocation37_spill] sm:$0xff] }
 0x2d8   :  { %1969 = vmatprep.subr.mxu0 %v3091_v50 }
 0x2d9   :  { %1970 = vmatpush3.msra.mxu0 %v3091_v50 }
 0x2da   :  { %1971 = vmatprep.subr.mxu0 %v3092_v63 }
 0x2db   :  { %1972 = vmatpush3.msra.mxu0 %v3092_v63 }
 0x2dc   :  { %1973 = vmatprep.subr.mxu0 %v3093_v22 }
 0x2dd   :  { %1974 = vmatpush3.msra.mxu0 %v3093_v22 }
 0x2de   :  { %1975 = vmatprep.subr.mxu0 %v3094_v48 }
 0x2df   :  { %1976 = vmatpush3.msra.mxu0 %v3094_v48 }
 0x2e0   :  { %1977 = vmatprep.subr.mxu0 %v3095_v61 }
 0x2e1   :  { %1978 = vmatpush3.msra.mxu0 %v3095_v61 }
 0x2e2   :  { %1979 = vmatprep.subr.mxu0 %v3096_v15 }
 0x2e3   :  { %1980 = vmatpush3.msra.mxu0 %v3096_v15 }
 0x2e4   :  { %1981 = vmatprep.subr.mxu0 %v3097_v62 }
 0x2e5   :  { %1982 = vmatpush3.msra.mxu0 %v3097_v62 }
 0x2e6   :  { %1983 = vmatprep.subr.mxu0 %v3098_v2 }
 0x2e7   :  { %1984 = vmatpush3.msra.mxu0 %v3098_v2 }
 0x2e8   :  { %1985 = vmatprep.subr.mxu0 %v3099_v3 }
 0x2e9   :  { %1986 = vmatpush3.msra.mxu0 %v3099_v3 }
 0x2ea   :  { %1987 = vmatprep.subr.mxu0 %v3100_v4 }
 0x2eb   :  { %1988 = vmatpush3.msra.mxu0 %v3100_v4 }
 0x2ec   :  { %1989 = vmatprep.subr.mxu0 %v3101_v5 }
 0x2ed   :  { %1990 = vmatpush3.msra.mxu0 %v3101_v5 }
 0x2ee   :  { %1991 = vmatprep.subr.mxu0 %v3102_v6 }
 0x2ef   :  { %1992 = vmatpush3.msra.mxu0 %v3102_v6 }
 0x2f0   :  { %1993 = vmatprep.subr.mxu0 %v3103_v7 }
 0x2f1   :  { %1994 = vmatpush3.msra.mxu0 %v3103_v7 }
 0x2f2   :  { %1995 = vmatprep.subr.mxu0 %v3104_v9 }
 0x2f3   :  { %1996 = vmatpush3.msra.mxu0 %v3104_v9 }
 0x2f4   :  { %1997 = vmatprep.subr.mxu0 %v3105_v10 }
 0x2f5   :  { %1998 = vmatpush3.msra.mxu0 %v3105_v10 }
 0x2f6   :  { %2037 = vmatprep.subr.mxu0 %v3106_v11  ;;  %2000 = vmatmul.mubr.f32.vlgmr.msra.gmra.mxu0 %v1044_v8 }
 0x2f7   :  { %2038 = vmatpush3.msra.mxu0 %v3106_v11 }
 0x2f8   :  { %2039 = vmatprep.subr.mxu0 %v3107_v12 }
 0x2f9   :  { %2040 = vmatpush3.msra.mxu0 %v3107_v12 }
 0x2fa   :  { %2041 = vmatprep.subr.mxu0 %v3108_v13 }
 0x2fb   :  { %2042 = vmatpush3.msra.mxu0 %v3108_v13 }
 0x2fc   :  { %2043 = vmatprep.subr.mxu0 %v3109_v14 }
 0x2fd   :  { %2044 = vmatpush3.msra.mxu0 %v3109_v14 }
 0x2fe   :  { %2045 = vmatprep.subr.mxu0 %v3110_v16 }
 0x2ff   :  { %2046 = vmatpush3.msra.mxu0 %v3110_v16 }
 0x300   :  { %2047 = vmatprep.subr.mxu0 %v3111_v18 }
 0x301   :  { %2048 = vmatpush3.msra.mxu0 %v3111_v18 }
 0x302   :  { %2049 = vmatprep.subr.mxu0 %v3112_v19 }
 0x303   :  { %2050 = vmatpush3.msra.mxu0 %v3112_v19 }
 0x304   :  { %2051 = vmatprep.subr.mxu0 %v3113_v20 }
 0x305   :  { %2052 = vmatpush3.msra.mxu0 %v3113_v20 }
 0x306   :  { %2053 = vmatprep.subr.mxu0 %v3114_v21 }
 0x307   :  { %2054 = vmatpush3.msra.mxu0 %v3114_v21 }
 0x308   :  { %2055 = vmatprep.subr.mxu0 %v3115_v23 }
 0x309   :  { %2056 = vmatpush3.msra.mxu0 %v3115_v23 }
 0x30a   :  { %2057 = vmatprep.subr.mxu0 %v3116_v24 }
 0x30b   :  { %2058 = vmatpush3.msra.mxu0 %v3116_v24 }
 0x30c   :  { %2059 = vmatprep.subr.mxu0 %v3117_v25 }
 0x30d   :  { %2060 = vmatpush3.msra.mxu0 %v3117_v25 }
 0x30e   :  { %2061 = vmatprep.subr.mxu0 %v3118_v26 }
 0x30f   :  { %2062 = vmatpush3.msra.mxu0 %v3118_v26 }
 0x310   :  { %2063 = vmatprep.subr.mxu0 %v3119_v27 }
 0x311   :  { %2064 = vmatpush3.msra.mxu0 %v3119_v27 }
 0x312   :  { %2065 = vmatprep.subr.mxu0 %v3120_v28 }
 0x313   :  { %2066 = vmatpush3.msra.mxu0 %v3120_v28 }
 0x314   :  { %2067 = vmatprep.subr.mxu0 %v3121_v29 }
 0x315   :  { %2068 = vmatpush3.msra.mxu0 %v3121_v29 }
 0x392   :  { %v1959_v32 = vpop.f32.mrf.mxu0 }
 0x393   :  { %v1145_v36 = vmul.f32 %v1959_v32, %v1142_v33 }
 0x394   :  { %v1122_v34 = vpop.f32.mrf.mxu0 }
 0x395   :  { %v1144_v35 = vmul.f32 %v1137_v31, %v1122_v34 }
 0x396   :  { %v1966_v37 = vpop.f32.mrf.mxu0 }
 0x397   :  { %2034 = vmatprep.mubr.f32.mxu1 %v1144_v35  ;;  %v1273_v42 = vmul.f32 %v1966_v37, %v1270_v40 }
 0x398   :  { %v1250_v39 = vpop.f32.mrf.mxu0  ;;  %2035 = vmatmul.mubr.f32.vlgmr.msra.gmra.mxu1 %v1145_v36 }
 0x399   :  { %v1272_v41 = vmul.f32 %v1265_v38, %v1250_v39 }
 0x39b   :  { %2069 = vmatprep.mubr.f32.mxu0 %v1272_v41 }
 0x39c   :  { %2070 = vmatmul.mubr.f32.vlgmr.msra.gmra.mxu0 %v1273_v42 }
 0x3b6   :  { %v2001_v43 = vpop.f32.mrf.mxu0 }
 0x3b8   :  { %v1372_v45 = vpop.f32.mrf.mxu0 }
 0x458   :  { %v2036_v44 = vpop.f32.mrf.mxu1 }
 0x459   :  { %v1453_v47 = vadd.f32 %v2036_v44, %v2001_v43 }
 0x45a   :  { %v1447_v46 = vpop.f32.mrf.mxu1 }
 0x45b   :  { %v1448_v51 = vadd.f32 %v1447_v46, %v1372_v45 }
 0x45c   :  { %v2071_v49 = vpop.f32.mrf.mxu0 }
 0x45d   :  { %v1548_v53 = vadd.f32 %v2071_v49, %v1453_v47 }
 0x45e   :  { %v1538_v54 = vpop.f32.mrf.mxu0 }
 0x45f   :  { %v1557_v60 = vadd.f32 %v2823_v30, %v1548_v53  ;;  %v1547_v1 = vadd.f32 %v1538_v54, %v1448_v51 }
 0x461   :  { %vm1559_vm3 = vcmp.gt.f32.partialorder %v1557_v60, 0.0  ;;  %v1561_v57 = vmul.f32 0.1, %v1557_v60  ;;  %v1556_v59 = vadd.f32 %v2823_v30, %v1547_v1 }
 0x463   :  { %v1563_v58 = vsel %vm1559_vm3, %v1557_v60, %v1561_v57  ;;  %vm1558_vm4 = vcmp.gt.f32.partialorder %v1556_v59, 0.0  ;;  %v1560_v0 = vmul.f32 0.1, %v1556_v59 }
 0x464   :  { %1566 = vst [vmem:[#allocation10 + $0x18] sm:$0xff] %v1563_v58 }
 0x465   :  { %v1562_v55 = vsel %vm1558_vm4, %v1556_v59, %v1560_v0 }
 0x466   :  { %1565 = vst [vmem:[#allocation10 + $0x10] sm:$0xff] %v1562_v55 }
 0x467   :  { %2176 = shalt.err (!%p2173_p10)
}
 0x468   :  { %1578 = dma.vmem_to_hbm [thread:$0]  %s1573_s9, 512, %s2922_s10, [#allocation4], %s2194_s16, %s2194_s16, %s2195_s17  }
 0x469   :  { %2191 = dma.done.wait [#allocation4], 512  }
 0x46a   :  { %2192 = vsyncadd [#allocation4], 4294966784 }
 0x46b   :  { %1582 = vsyncpa [#allocation3], 1 }
 0x46c   :  { %1583 = vsyncpa [#allocation6], 1 }
 0x46d   :  { %1584 = vsyncpa [#allocation9], 1 }
 0x46e   :  { %1585 = vsyncpa [#allocation4], 1 }

</bundles_post_ra>
